<compile_context>
chip_gen: v5e
topology: v5e:2x2
jax: 0.10.0
libtpu: 0.0.40
codegen_flags: <defaults>
</compile_context>

<pallas_src>
import functools

import numpy as np

import jax
import jax.numpy as jnp
from jax.experimental import pallas as pl
from jax.experimental.pallas import tpu as pltpu


def _round_up(x, m):
    return ((x + m - 1) // m) * m


def _divisors(n):
    return sorted(d for d in range(1, n + 1) if n % d == 0)


def _vmem_budget_bytes():
    """~80% of the attached chip's physical VMEM (leaves Mosaic headroom on
    64 MiB parts, and lets 128 MiB parts go well past the old 64 MiB clamp)."""
    cap = 64 * 2 ** 20
    try:
        cap = int(getattr(pltpu.get_tpu_info(), "vmem_capacity_bytes", cap))
    except Exception:
        pass
    return max(int(cap * 0.8), 16 * 2 ** 20)


def _working_set_bytes(tile_ho, tile_hin, Wp, Wo, cin_tile, cout_tile,
                       KH, KW, in_itemsize, out_itemsize):
    """Double-buffered blocks + accumulator + per-tap slice/matmul temporaries."""
    x_blk = tile_hin * Wp * cin_tile * in_itemsize
    w_blk = KH * KW * cin_tile * cout_tile * in_itemsize
    o_blk = tile_ho * Wo * cout_tile * out_itemsize
    bn_blk = 2 * cout_tile * 4
    acc = tile_ho * Wo * cout_tile * 4
    temps = (2 * tile_hin * Wo * cin_tile * in_itemsize     # W-sliced patches
             + 2 * tile_ho * Wo * cout_tile * 4)            # partial sums
    return 2 * (x_blk + w_blk + o_blk + bn_blk) + acc + temps


def _aspp_kernel(x_ref, w_ref, scale_ref, shift_ref, o_ref, acc_ref, *,
                 tile_Ho, Wo, KH, KW, dilation, flatten):
    """Grid = (N, Ho-row tiles, Cout tiles, Cin tiles); Cin is the reduction axis.

    x_ref:     (1, tile_Hin, Wp, cin_tile)   padded input rows (+ dilation halo)
    w_ref:     (KH*KW, cin_tile, cout_tile)  conv weights, tap-major
    scale_ref: (1, cout_tile)                folded BN scale (f32)
    shift_ref: (1, cout_tile)                folded BN shift (f32)
    o_ref:     (1, tile_Ho, Wo, cout_tile)   output tile
    acc_ref:   f32 VMEM accumulator
    """
    ci = pl.program_id(3)

    # Sum all KH*KW tap matmuls into a local value -> one accumulator RMW per
    # grid step (Mosaic chains the dots; MRB in-place accumulate on v7x).
    acc = None
    for dx in range(KW):
        # Hoist the sublane-misaligned W slice out of the dy loop: one shifted
        # copy per dx; the per-dy H slices below are leading-dim (cheap).
        x_dx = x_ref[0, :, dx * dilation:dx * dilation + Wo, :]
        for dy in range(KH):
            patch = x_dx[dy * dilation:dy * dilation + tile_Ho]
            w_tap = w_ref[dy * KW + dx]                    # (cin_tile, cout_tile)
            if flatten:
                # Clean 2-D (M, K) x (K, N) MXU shape; operands stay in their
                # compute dtype (bf16 goes straight to the bf16 MXU path).
                contrib = jnp.dot(
                    patch.reshape(tile_Ho * Wo, patch.shape[-1]), w_tap,
                    preferred_element_type=jnp.float32)
            else:
                contrib = jax.lax.dot_general(
                    patch, w_tap, (((2,), (0,)), ((), ())),
                    preferred_element_type=jnp.float32)
            acc = contrib if acc is None else acc + contrib

    @pl.when(ci == 0)
    def _():
        acc_ref[...] = acc          # first Cin chunk: store (no zero-init pass)

    @pl.when(ci > 0)
    def _():
        acc_ref[...] += acc

    @pl.when(ci == pl.num_programs(3) - 1)
    def _():
        y = acc_ref[...] * scale_ref[0] + shift_ref[0]     # folded BN (eval)
        y = jnp.maximum(y, 0.0)                            # ReLU
        if flatten:
            y = y.reshape(tile_Ho, Wo, y.shape[-1])
        o_ref[0] = y.astype(o_ref.dtype)


def aspp_module_forward(x_nchw, weight, bn_gamma, bn_beta, bn_mean, bn_var, *,
                        padding, dilation, eps=1e-5,
                        compute_dtype=jnp.bfloat16):
    """Forward pass of _ASPPModule (conv2d no-bias -> BN(eval) -> ReLU).

    x_nchw: (N, Cin, H, W); weight: (Cout, Cin, KH, KW)   (PyTorch layouts)
    compute_dtype: dtype of the conv operands fed to the MXU (default bf16);
                   accumulation / BN / output remain f32-accurate.
    """
    N, Cin, H, W = x_nchw.shape
    Cout, _, KH, KW = weight.shape

    Ho = H + 2 * padding - dilation * (KH - 1)
    Wo = W + 2 * padding - dilation * (KW - 1)
    assert Ho > 0 and Wo > 0, "conv output would be empty for this padding/dilation"

    out_dtype = x_nchw.dtype
    cdtype = np.dtype(compute_dtype if compute_dtype is not None else x_nchw.dtype)
    in_itemsize = cdtype.itemsize
    out_itemsize = np.dtype(out_dtype).itemsize

    # ---- lane-dense channel tiling ------------------------------------------
    cout_tile = 256 if Cout % 256 == 0 else 128
    Cout_pad = _round_up(Cout, cout_tile)
    if Cin % 512 == 0:
        cin_pref = 512
    elif Cin % 256 == 0:
        cin_pref = 256
    else:
        cin_pref = 128

    halo = dilation * (KH - 1)
    Hp, Wp = H + 2 * padding, W + 2 * padding

    # ---- choose (cin_tile, tile_Ho) to fit the per-chip VMEM budget ----------
    budget = _vmem_budget_bytes()
    # With a single (batch, Cout-tile) entry, split rows so both v7x TCs work.
    need_split = N * (Cout_pad // cout_tile) < 2
    divs = _divisors(Ho)
    chosen = None
    cin_t = cin_pref
    while chosen is None and cin_t >= 128:
        fitting = [t for t in divs if _working_set_bytes(
            t, t + halo, Wp, Wo, cin_t, cout_tile, KH, KW,
            in_itemsize, out_itemsize) <= budget]
        if fitting:
            tile = fitting[-1]                         # largest fitting row tile
            if need_split:
                split = [t for t in fitting if Ho // t >= 2 and t >= min(8, Ho)]
                if split:
                    tile = split[-1]
            chosen = (cin_t, tile)
        else:
            cin_t //= 2
    if chosen is None:
        # Nothing fits even at cin_tile=128: take a small non-degenerate row
        # tile and let the compiler do its best with the clamped limit.
        small = [t for t in divs if t >= min(8, Ho)]
        chosen = (128, small[0] if small else Ho)
    cin_tile, tile_Ho = chosen
    Cin_pad = _round_up(Cin, cin_tile)

    # ---- glue (plain JAX): layout, spatial/channel zero-pad, BN folding ------
    # TODO(synk): the NCHW interface costs two transposes + a pad as separate
    # XLA ops, and the zero halo (up to ~3x the live rows at dilation 24) is
    # streamed from HBM; an NHWC end-to-end model plus in-kernel boundary-tap
    # masking would remove both.  BN is folded in eval mode (no running-stat
    # update as in PyTorch training mode).
    x_nhwc = jnp.transpose(x_nchw, (0, 2, 3, 1))
    x_pad = jnp.pad(x_nhwc, ((0, 0), (padding, padding), (padding, padding),
                             (0, Cin_pad - Cin))).astype(cdtype)

    # (Cout, Cin, KH, KW) -> (KH*KW, Cin_pad, Cout_pad), tap-major.
    w_taps = jnp.transpose(weight, (2, 3, 1, 0)).reshape(KH * KW, Cin, Cout)
    w_taps = jnp.pad(w_taps, ((0, 0), (0, Cin_pad - Cin),
                              (0, Cout_pad - Cout))).astype(cdtype)

    inv_std = bn_gamma / jnp.sqrt(bn_var + eps)
    scale = jnp.pad(inv_std, (0, Cout_pad - Cout)).reshape(1, Cout_pad)
    scale = scale.astype(jnp.float32)
    shift = jnp.pad(bn_beta - bn_mean * inv_std,
                    (0, Cout_pad - Cout)).reshape(1, Cout_pad)
    shift = shift.astype(jnp.float32)

    # Flatten to a 2-D MXU shape only when Wo is aligned to the sublane packing
    # of the compute dtype (8 rows for f32, 16 for bf16).
    sublane = 8 * max(1, 4 // in_itemsize)
    flatten = (Wo % sublane == 0)

    def _build_and_call(tile_ho):
        tile_hin = tile_ho + halo
        n_ho = Ho // tile_ho
        working = _working_set_bytes(tile_ho, tile_hin, Wp, Wo, cin_tile,
                                     cout_tile, KH, KW, in_itemsize,
                                     out_itemsize)
        vmem_limit = int(min(max(working, 16 * 2 ** 20), budget))
        acc_shape = ((tile_ho * Wo, cout_tile) if flatten
                     else (tile_ho, Wo, cout_tile))

        if n_ho == 1:
            # Whole padded plane per block (tile_hin == Hp): plain Blocked spec.
            x_spec = pl.BlockSpec((1, Hp, Wp, cin_tile),
                                  lambda n, ho, co, ci: (n, 0, 0, ci))
        else:
            # Overlapping row windows: element offset + (KH-1)*dilation halo.
            x_spec = pl.BlockSpec((1, pl.Element(tile_hin), Wp, cin_tile),
                                  lambda n, ho, co, ci: (n, ho * tile_ho, 0, ci))

        kernel = functools.partial(_aspp_kernel, tile_Ho=tile_ho, Wo=Wo, KH=KH,
                                   KW=KW, dilation=dilation, flatten=flatten)
        grid = (N, n_ho, Cout_pad // cout_tile, Cin_pad // cin_tile)

        return pl.pallas_call(
            kernel,
            out_shape=jax.ShapeDtypeStruct((N, Ho, Wo, Cout_pad), out_dtype),
            grid_spec=pltpu.PrefetchScalarGridSpec(
                num_scalar_prefetch=0,
                grid=grid,
                in_specs=[
                    x_spec,
                    pl.BlockSpec((KH * KW, cin_tile, cout_tile),
                                 lambda n, ho, co, ci: (0, ci, co)),
                    pl.BlockSpec((1, cout_tile), lambda n, ho, co, ci: (0, co)),
                    pl.BlockSpec((1, cout_tile), lambda n, ho, co, ci: (0, co)),
                ],
                out_specs=pl.BlockSpec((1, tile_ho, Wo, cout_tile),
                                       lambda n, ho, co, ci: (n, ho, 0, co)),
                scratch_shapes=[pltpu.VMEM(acc_shape, jnp.float32)],
            ),
            compiler_params=pltpu.CompilerParams(
                dimension_semantics=("parallel", "parallel", "parallel",
                                     "arbitrary"),
                vmem_limit_bytes=vmem_limit),
        )(x_pad, w_taps, scale, shift)

    if tile_Ho < Ho:
        try:
            out = _build_and_call(tile_Ho)
        except Exception:
            # Element-indexed input windows unavailable in this Pallas build:
            # fall back to the (correct, less VMEM-friendly) whole-plane layout.
            out = _build_and_call(Ho)
    else:
        out = _build_and_call(Ho)

    out = out[:, :, :, :Cout]                               # strip Cout padding
    return jnp.transpose(out, (0, 3, 1, 2))                 # back to NCHW


def _reference(x_nchw, weight, bn_gamma, bn_beta, bn_mean, bn_var,
               *, padding, dilation, eps=1e-5):
    y = jax.lax.conv_general_dilated(
        x_nchw, weight,
        window_strides=(1, 1),
        padding=((padding, padding), (padding, padding)),
        rhs_dilation=(dilation, dilation),
        dimension_numbers=("NCHW", "OIHW", "NCHW"))
    inv_std = bn_gamma / jnp.sqrt(bn_var + eps)
    scale = inv_std.reshape(1, -1, 1, 1)
    shift = (bn_beta - bn_mean * inv_std).reshape(1, -1, 1, 1)
    return jnp.maximum(y * scale + shift, 0.0)


if __name__ == "__main__":
    # Module hyperparameters (a typical ASPP branch): 3x3 atrous conv.
    inplanes, planes = 4, 8
    kernel_size, padding, dilation = 3, 2, 2
    N, H, W = 2, 16, 16

    key = jax.random.PRNGKey(0)
    kx, kw = jax.random.split(key)

    x = jax.random.normal(kx, (N, inplanes, H, W), dtype=jnp.float32)

    # kaiming_normal_ (fan_in mode, gain=sqrt(2)) on the conv weight.
    fan_in = inplanes * kernel_size * kernel_size
    std = (2.0 / fan_in) ** 0.5
    weight = std * jax.random.normal(
        kw, (planes, inplanes, kernel_size, kernel_size), dtype=jnp.float32)

    # BatchNorm params as set by _init_weight (+ fresh running stats), eval mode.
    bn_gamma = jnp.ones((planes,), jnp.float32)
    bn_beta = jnp.zeros((planes,), jnp.float32)
    bn_mean = jnp.zeros((planes,), jnp.float32)
    bn_var = jnp.ones((planes,), jnp.float32)

    ref = _reference(x, weight, bn_gamma, bn_beta, bn_mean, bn_var,
                     padding=padding, dilation=dilation)

    # f32 operand path (matches the XLA conv reference tightly).
    out = aspp_module_forward(x, weight, bn_gamma, bn_beta, bn_mean, bn_var,
                              padding=padding, dilation=dilation,
                              compute_dtype=jnp.float32)
    out = jax.block_until_ready(out)
    assert out.shape == (N, planes, H, W)
    assert jnp.allclose(out, ref, atol=1e-4, rtol=1e-4)

    # Default bf16 operand path (native MXU dtype); looser tolerance.
    out_bf16 = aspp_module_forward(x, weight, bn_gamma, bn_beta, bn_mean,
                                   bn_var, padding=padding, dilation=dilation)
    out_bf16 = jax.block_until_ready(out_bf16)
    assert out_bf16.shape == (N, planes, H, W)
    assert jnp.allclose(out_bf16, ref, atol=1e-1, rtol=1e-1)

    # Batch-1 path: exercises the spatial Ho-row tiling (overlapping element-
    # offset input windows) used to keep both v7x TensorCores busy.
    ref1 = _reference(x[:1], weight, bn_gamma, bn_beta, bn_mean, bn_var,
                      padding=padding, dilation=dilation)
    out1 = aspp_module_forward(x[:1], weight, bn_gamma, bn_beta, bn_mean,
                               bn_var, padding=padding, dilation=dilation,
                               compute_dtype=jnp.float32)
    out1 = jax.block_until_ready(out1)
    assert out1.shape == (1, planes, H, W)
    assert jnp.allclose(out1, ref1, atol=1e-4, rtol=1e-4)

    print("KERNEL_OK")
</pallas_src>

<mosaic_0001>
module attributes {stable_mosaic.version = 11 : i64} {
  func.func @_aspp_kernel(%arg0: i32, %arg1: i32, %arg2: i32, %arg3: i32, %arg4: memref<1x20x20x128xf32, #tpu.memory_space<vmem>>, %arg5: memref<9x128x128xf32, #tpu.memory_space<vmem>>, %arg6: memref<1x128xf32, #tpu.memory_space<vmem>>, %arg7: memref<1x128xf32, #tpu.memory_space<vmem>>, %arg8: memref<1x16x16x128xf32, #tpu.memory_space<vmem>>, %arg9: memref<256x128xf32, #tpu.memory_space<vmem>>) attributes {dimension_semantics = [#tpu.dimension_semantics<parallel>, #tpu.dimension_semantics<parallel>, #tpu.dimension_semantics<parallel>, #tpu.dimension_semantics<arbitrary>], iteration_bounds = array<i64: 2, 1, 1, 1>, scalar_prefetch = 0 : i64, scratch_operands = 1 : i64, tpu.core_type = #tpu.core_type<tc>, window_params = [{transform_indices = @transform_0, window_bounds = array<i64: 1, 20, 20, 128>}, {transform_indices = @transform_1, window_bounds = array<i64: 9, 128, 128>}, {transform_indices = @transform_2, window_bounds = array<i64: 1, 128>}, {transform_indices = @transform_3, window_bounds = array<i64: 1, 128>}, {transform_indices = @transform_4, window_bounds = array<i64: 1, 16, 16, 128>}]} {
    %c0 = arith.constant 0 : index
    %c0_0 = arith.constant 0 : index
    %c0_1 = arith.constant 0 : index
    %c0_2 = arith.constant 0 : index
    %0 = vector.load %arg4[%c0, %c0_0, %c0_1, %c0_2] : memref<1x20x20x128xf32, #tpu.memory_space<vmem>>, vector<1x20x16x128xf32>
    %1 = vector.shape_cast %0 : vector<1x20x16x128xf32> to vector<20x16x128xf32>
    %2 = vector.extract_strided_slice %1 {offsets = [0, 0, 0], sizes = [16, 16, 128], strides = [1, 1, 1]} : vector<20x16x128xf32> to vector<16x16x128xf32>
    %c0_3 = arith.constant 0 : index
    %c0_4 = arith.constant 0 : index
    %c0_5 = arith.constant 0 : index
    %3 = vector.load %arg5[%c0_3, %c0_4, %c0_5] : memref<9x128x128xf32, #tpu.memory_space<vmem>>, vector<1x128x128xf32>
    %4 = vector.shape_cast %3 : vector<1x128x128xf32> to vector<128x128xf32>
    %5 = vector.shape_cast %2 : vector<16x16x128xf32> to vector<256x128xf32>
    %cst = arith.constant dense<0.000000e+00> : vector<256x128xf32>
    %6 = tpu.matmul %5, %4, %cst {dimension_numbers = #tpu.dot_dimension_numbers<[1], [0], [0], [1], [0, 0, 1, 1], [], []>} : vector<256x128xf32>, vector<128x128xf32>, vector<256x128xf32> -> vector<256x128xf32>
    %7 = vector.extract_strided_slice %1 {offsets = [2, 0, 0], sizes = [16, 16, 128], strides = [1, 1, 1]} : vector<20x16x128xf32> to vector<16x16x128xf32>
    %c3 = arith.constant 3 : index
    %c0_6 = arith.constant 0 : index
    %c0_7 = arith.constant 0 : index
    %8 = vector.load %arg5[%c3, %c0_6, %c0_7] : memref<9x128x128xf32, #tpu.memory_space<vmem>>, vector<1x128x128xf32>
    %9 = vector.shape_cast %8 : vector<1x128x128xf32> to vector<128x128xf32>
    %10 = vector.shape_cast %7 : vector<16x16x128xf32> to vector<256x128xf32>
    %cst_8 = arith.constant dense<0.000000e+00> : vector<256x128xf32>
    %11 = tpu.matmul %10, %9, %cst_8 {dimension_numbers = #tpu.dot_dimension_numbers<[1], [0], [0], [1], [0, 0, 1, 1], [], []>} : vector<256x128xf32>, vector<128x128xf32>, vector<256x128xf32> -> vector<256x128xf32>
    %12 = arith.addf %6, %11 : vector<256x128xf32>
    %13 = vector.extract_strided_slice %1 {offsets = [4, 0, 0], sizes = [16, 16, 128], strides = [1, 1, 1]} : vector<20x16x128xf32> to vector<16x16x128xf32>
    %c6 = arith.constant 6 : index
    %c0_9 = arith.constant 0 : index
    %c0_10 = arith.constant 0 : index
    %14 = vector.load %arg5[%c6, %c0_9, %c0_10] : memref<9x128x128xf32, #tpu.memory_space<vmem>>, vector<1x128x128xf32>
    %15 = vector.shape_cast %14 : vector<1x128x128xf32> to vector<128x128xf32>
    %16 = vector.shape_cast %13 : vector<16x16x128xf32> to vector<256x128xf32>
    %cst_11 = arith.constant dense<0.000000e+00> : vector<256x128xf32>
    %17 = tpu.matmul %16, %15, %cst_11 {dimension_numbers = #tpu.dot_dimension_numbers<[1], [0], [0], [1], [0, 0, 1, 1], [], []>} : vector<256x128xf32>, vector<128x128xf32>, vector<256x128xf32> -> vector<256x128xf32>
    %18 = arith.addf %12, %17 : vector<256x128xf32>
    %c0_12 = arith.constant 0 : index
    %c0_13 = arith.constant 0 : index
    %c2 = arith.constant 2 : index
    %c0_14 = arith.constant 0 : index
    %19 = vector.load %arg4[%c0_12, %c0_13, %c2, %c0_14] : memref<1x20x20x128xf32, #tpu.memory_space<vmem>>, vector<1x20x16x128xf32>
    %20 = vector.shape_cast %19 : vector<1x20x16x128xf32> to vector<20x16x128xf32>
    %21 = vector.extract_strided_slice %20 {offsets = [0, 0, 0], sizes = [16, 16, 128], strides = [1, 1, 1]} : vector<20x16x128xf32> to vector<16x16x128xf32>
    %c1 = arith.constant 1 : index
    %c0_15 = arith.constant 0 : index
    %c0_16 = arith.constant 0 : index
    %22 = vector.load %arg5[%c1, %c0_15, %c0_16] : memref<9x128x128xf32, #tpu.memory_space<vmem>>, vector<1x128x128xf32>
    %23 = vector.shape_cast %22 : vector<1x128x128xf32> to vector<128x128xf32>
    %24 = vector.shape_cast %21 : vector<16x16x128xf32> to vector<256x128xf32>
    %cst_17 = arith.constant dense<0.000000e+00> : vector<256x128xf32>
    %25 = tpu.matmul %24, %23, %cst_17 {dimension_numbers = #tpu.dot_dimension_numbers<[1], [0], [0], [1], [0, 0, 1, 1], [], []>} : vector<256x128xf32>, vector<128x128xf32>, vector<256x128xf32> -> vector<256x128xf32>
    %26 = arith.addf %18, %25 : vector<256x128xf32>
    %27 = vector.extract_strided_slice %20 {offsets = [2, 0, 0], sizes = [16, 16, 128], strides = [1, 1, 1]} : vector<20x16x128xf32> to vector<16x16x128xf32>
    %c4 = arith.constant 4 : index
    %c0_18 = arith.constant 0 : index
    %c0_19 = arith.constant 0 : index
    %28 = vector.load %arg5[%c4, %c0_18, %c0_19] : memref<9x128x128xf32, #tpu.memory_space<vmem>>, vector<1x128x128xf32>
    %29 = vector.shape_cast %28 : vector<1x128x128xf32> to vector<128x128xf32>
    %30 = vector.shape_cast %27 : vector<16x16x128xf32> to vector<256x128xf32>
    %cst_20 = arith.constant dense<0.000000e+00> : vector<256x128xf32>
    %31 = tpu.matmul %30, %29, %cst_20 {dimension_numbers = #tpu.dot_dimension_numbers<[1], [0], [0], [1], [0, 0, 1, 1], [], []>} : vector<256x128xf32>, vector<128x128xf32>, vector<256x128xf32> -> vector<256x128xf32>
    %32 = arith.addf %26, %31 : vector<256x128xf32>
    %33 = vector.extract_strided_slice %20 {offsets = [4, 0, 0], sizes = [16, 16, 128], strides = [1, 1, 1]} : vector<20x16x128xf32> to vector<16x16x128xf32>
    %c7 = arith.constant 7 : index
    %c0_21 = arith.constant 0 : index
    %c0_22 = arith.constant 0 : index
    %34 = vector.load %arg5[%c7, %c0_21, %c0_22] : memref<9x128x128xf32, #tpu.memory_space<vmem>>, vector<1x128x128xf32>
    %35 = vector.shape_cast %34 : vector<1x128x128xf32> to vector<128x128xf32>
    %36 = vector.shape_cast %33 : vector<16x16x128xf32> to vector<256x128xf32>
    %cst_23 = arith.constant dense<0.000000e+00> : vector<256x128xf32>
    %37 = tpu.matmul %36, %35, %cst_23 {dimension_numbers = #tpu.dot_dimension_numbers<[1], [0], [0], [1], [0, 0, 1, 1], [], []>} : vector<256x128xf32>, vector<128x128xf32>, vector<256x128xf32> -> vector<256x128xf32>
    %38 = arith.addf %32, %37 : vector<256x128xf32>
    %c0_24 = arith.constant 0 : index
    %c0_25 = arith.constant 0 : index
    %c4_26 = arith.constant 4 : index
    %c0_27 = arith.constant 0 : index
    %39 = vector.load %arg4[%c0_24, %c0_25, %c4_26, %c0_27] : memref<1x20x20x128xf32, #tpu.memory_space<vmem>>, vector<1x20x16x128xf32>
    %40 = vector.shape_cast %39 : vector<1x20x16x128xf32> to vector<20x16x128xf32>
    %41 = vector.extract_strided_slice %40 {offsets = [0, 0, 0], sizes = [16, 16, 128], strides = [1, 1, 1]} : vector<20x16x128xf32> to vector<16x16x128xf32>
    %c2_28 = arith.constant 2 : index
    %c0_29 = arith.constant 0 : index
    %c0_30 = arith.constant 0 : index
    %42 = vector.load %arg5[%c2_28, %c0_29, %c0_30] : memref<9x128x128xf32, #tpu.memory_space<vmem>>, vector<1x128x128xf32>
    %43 = vector.shape_cast %42 : vector<1x128x128xf32> to vector<128x128xf32>
    %44 = vector.shape_cast %41 : vector<16x16x128xf32> to vector<256x128xf32>
    %cst_31 = arith.constant dense<0.000000e+00> : vector<256x128xf32>
    %45 = tpu.matmul %44, %43, %cst_31 {dimension_numbers = #tpu.dot_dimension_numbers<[1], [0], [0], [1], [0, 0, 1, 1], [], []>} : vector<256x128xf32>, vector<128x128xf32>, vector<256x128xf32> -> vector<256x128xf32>
    %46 = arith.addf %38, %45 : vector<256x128xf32>
    %47 = vector.extract_strided_slice %40 {offsets = [2, 0, 0], sizes = [16, 16, 128], strides = [1, 1, 1]} : vector<20x16x128xf32> to vector<16x16x128xf32>
    %c5 = arith.constant 5 : index
    %c0_32 = arith.constant 0 : index
    %c0_33 = arith.constant 0 : index
    %48 = vector.load %arg5[%c5, %c0_32, %c0_33] : memref<9x128x128xf32, #tpu.memory_space<vmem>>, vector<1x128x128xf32>
    %49 = vector.shape_cast %48 : vector<1x128x128xf32> to vector<128x128xf32>
    %50 = vector.shape_cast %47 : vector<16x16x128xf32> to vector<256x128xf32>
    %cst_34 = arith.constant dense<0.000000e+00> : vector<256x128xf32>
    %51 = tpu.matmul %50, %49, %cst_34 {dimension_numbers = #tpu.dot_dimension_numbers<[1], [0], [0], [1], [0, 0, 1, 1], [], []>} : vector<256x128xf32>, vector<128x128xf32>, vector<256x128xf32> -> vector<256x128xf32>
    %52 = arith.addf %46, %51 : vector<256x128xf32>
    %53 = vector.extract_strided_slice %40 {offsets = [4, 0, 0], sizes = [16, 16, 128], strides = [1, 1, 1]} : vector<20x16x128xf32> to vector<16x16x128xf32>
    %c8 = arith.constant 8 : index
    %c0_35 = arith.constant 0 : index
    %c0_36 = arith.constant 0 : index
    %54 = vector.load %arg5[%c8, %c0_35, %c0_36] : memref<9x128x128xf32, #tpu.memory_space<vmem>>, vector<1x128x128xf32>
    %55 = vector.shape_cast %54 : vector<1x128x128xf32> to vector<128x128xf32>
    %56 = vector.shape_cast %53 : vector<16x16x128xf32> to vector<256x128xf32>
    %cst_37 = arith.constant dense<0.000000e+00> : vector<256x128xf32>
    %57 = tpu.matmul %56, %55, %cst_37 {dimension_numbers = #tpu.dot_dimension_numbers<[1], [0], [0], [1], [0, 0, 1, 1], [], []>} : vector<256x128xf32>, vector<128x128xf32>, vector<256x128xf32> -> vector<256x128xf32>
    %58 = arith.addf %52, %57 : vector<256x128xf32>
    %c0_i32 = arith.constant 0 : i32
    %59 = arith.cmpi eq, %arg3, %c0_i32 : i32
    %60 = arith.extui %59 : i1 to i32
    %c0_i32_38 = arith.constant 0 : i32
    %61 = arith.cmpi ne, %60, %c0_i32_38 : i32
    scf.if %61 {
      %c0_43 = arith.constant 0 : index
      %c0_44 = arith.constant 0 : index
      %68 = vector.load %arg9[%c0_43, %c0_44] : memref<256x128xf32, #tpu.memory_space<vmem>>, vector<256x128xf32>
      tpu.vector_store %arg9[%c0_43, %c0_44], %58 {strides = array<i32>} : memref<256x128xf32, #tpu.memory_space<vmem>>, vector<256x128xf32>,
    } else {
    }
    %c0_i32_39 = arith.constant 0 : i32
    %62 = arith.cmpi sgt, %arg3, %c0_i32_39 : i32
    %63 = arith.extui %62 : i1 to i32
    %c0_i32_40 = arith.constant 0 : i32
    %64 = arith.cmpi ne, %63, %c0_i32_40 : i32
    scf.if %64 {
      %c0_43 = arith.constant 0 : index
      %c0_44 = arith.constant 0 : index
      %68 = vector.load %arg9[%c0_43, %c0_44] : memref<256x128xf32, #tpu.memory_space<vmem>>, vector<256x128xf32>
      %69 = arith.addf %68, %58 : vector<256x128xf32>
      %c0_45 = arith.constant 0 : index
      %c0_46 = arith.constant 0 : index
      %70 = vector.load %arg9[%c0_45, %c0_46] : memref<256x128xf32, #tpu.memory_space<vmem>>, vector<256x128xf32>
      tpu.vector_store %arg9[%c0_45, %c0_46], %69 {strides = array<i32>} : memref<256x128xf32, #tpu.memory_space<vmem>>, vector<256x128xf32>,
    } else {
    }
    %c0_i32_41 = arith.constant 0 : i32
    %65 = arith.cmpi eq, %arg3, %c0_i32_41 : i32
    %66 = arith.extui %65 : i1 to i32
    %c0_i32_42 = arith.constant 0 : i32
    %67 = arith.cmpi ne, %66, %c0_i32_42 : i32
    scf.if %67 {
      %c0_43 = arith.constant 0 : index
      %c0_44 = arith.constant 0 : index
      %68 = vector.load %arg9[%c0_43, %c0_44] : memref<256x128xf32, #tpu.memory_space<vmem>>, vector<256x128xf32>
      %c0_45 = arith.constant 0 : index
      %c0_46 = arith.constant 0 : index
      %69 = vector.load %arg6[%c0_45, %c0_46] : memref<1x128xf32, #tpu.memory_space<vmem>>, vector<1x128xf32>
      %70 = vector.shape_cast %69 : vector<1x128xf32> to vector<128xf32>
      %71 = vector.shape_cast %70 : vector<128xf32> to vector<1x128xf32>
      %72 = vector.broadcast %71 : vector<1x128xf32> to vector<256x128xf32>
      %73 = arith.mulf %68, %72 : vector<256x128xf32>
      %c0_47 = arith.constant 0 : index
      %c0_48 = arith.constant 0 : index
      %74 = vector.load %arg7[%c0_47, %c0_48] : memref<1x128xf32, #tpu.memory_space<vmem>>, vector<1x128xf32>
      %75 = vector.shape_cast %74 : vector<1x128xf32> to vector<128xf32>
      %76 = vector.shape_cast %75 : vector<128xf32> to vector<1x128xf32>
      %77 = vector.broadcast %76 : vector<1x128xf32> to vector<256x128xf32>
      %78 = arith.addf %73, %77 : vector<256x128xf32>
      %cst_49 = arith.constant 0.000000e+00 : f32
      %79 = vector.broadcast %cst_49 : f32 to vector<256x128xf32>
      %80 = arith.maximumf %78, %79 : vector<256x128xf32>
      %81 = vector.shape_cast %80 : vector<256x128xf32> to vector<16x16x128xf32>
      %c0_50 = arith.constant 0 : index
      %c0_51 = arith.constant 0 : index
      %c0_52 = arith.constant 0 : index
      %c0_53 = arith.constant 0 : index
      %82 = vector.load %arg8[%c0_50, %c0_51, %c0_52, %c0_53] : memref<1x16x16x128xf32, #tpu.memory_space<vmem>>, vector<1x16x16x128xf32>
      %83 = vector.shape_cast %82 : vector<1x16x16x128xf32> to vector<16x16x128xf32>
      %84 = vector.shape_cast %81 : vector<16x16x128xf32> to vector<1x16x16x128xf32>
      tpu.vector_store %arg8[%c0_50, %c0_51, %c0_52, %c0_53], %84 {strides = array<i32>} : memref<1x16x16x128xf32, #tpu.memory_space<vmem>>, vector<1x16x16x128xf32>,
    } else {
    }
    return
  }
  func.func @transform_0(%arg0: i32, %arg1: i32, %arg2: i32, %arg3: i32) -> (i32, i32, i32, i32) {
    %c0_i32 = arith.constant 0 : i32
    %c0_i32_0 = arith.constant 0 : i32
    %c0_i32_1 = arith.constant 0 : i32
    return %arg0, %c0_i32, %c0_i32_0, %arg3 : i32, i32, i32, i32
  }
  func.func @transform_1(%arg0: i32, %arg1: i32, %arg2: i32, %arg3: i32) -> (i32, i32, i32) {
    %c0_i32 = arith.constant 0 : i32
    %c0_i32_0 = arith.constant 0 : i32
    return %c0_i32, %arg3, %arg2 : i32, i32, i32
  }
  func.func @transform_2(%arg0: i32, %arg1: i32, %arg2: i32, %arg3: i32) -> (i32, i32) {
    %c0_i32 = arith.constant 0 : i32
    %c0_i32_0 = arith.constant 0 : i32
    return %c0_i32, %arg2 : i32, i32
  }
  func.func @transform_3(%arg0: i32, %arg1: i32, %arg2: i32, %arg3: i32) -> (i32, i32) {
    %c0_i32 = arith.constant 0 : i32
    %c0_i32_0 = arith.constant 0 : i32
    return %c0_i32, %arg2 : i32, i32
  }
  func.func @transform_4(%arg0: i32, %arg1: i32, %arg2: i32, %arg3: i32) -> (i32, i32, i32, i32) {
    %c0_i32 = arith.constant 0 : i32
    %c0_i32_0 = arith.constant 0 : i32
    return %arg0, %arg1, %c0_i32, %arg2 : i32, i32, i32, i32
  }
}

</mosaic_0001>

<bundles_post_ra>
// kernel: tpu_custom_call.1
= control target key start
LH: loop header
LB: loop body
LE: loop exit
PB: predicated region body
PF: predicated region fallthrough
CT: control target
= control target key end

     0   :  { %9 = vsyncpa [#allocation4], 0  ;;  %s4010_s0 = inlined_call_operand.vmem [shape: f32[2,20,20,128], index: 0, kind: input, shape index: {}]   ;;  %s4011_s1 = inlined_call_operand.vmem [shape: f32[9,128,128], index: 1, kind: input, shape index: {}]   ;;  %s4012_s2 = inlined_call_operand.vmem [shape: f32[1,128], index: 2, kind: input, shape index: {}]   ;;  %s4013_s3 = inlined_call_operand.vmem [shape: f32[1,128], index: 3, kind: input, shape index: {}]   ;;  %s4014_s4 = inlined_call_operand.hbm [shape: f32[2,16,16,128], index: 4, kind: output, shape index: {}]  }
   0x1   :  { %11 = vsyncpa [#allocation4 + $0x1], 0  ;;  %s2630_s15 = smov 0   ;;  %s2632_s16 = smov 0  }
   0x2   :  { %s2634_s17 = smov 0   ;;  %s2636_s18 = smov 0  }
   0x3   :  { %s2638_s19 = smov 0   ;;  %s2640_s20 = smov 0  }
   0x4 LB: > { %s2267_s21 = sadd.s32 4294967295, %s2601_s20   ;;  %s2268_s22 = sadd.s32 4294967294, %s2601_s20   ;;  %s2601_s20 = sphi %s2640_s20, %s17_s20   ;;  %s2597_s19 = sphi %s2638_s19, %s4048_s19   ;;  %s2593_s18 = sphi %s2636_s18, %s4047_s18   ;;  %s2589_s17 = sphi %s2634_s17, %s4046_s17   ;;  %s2585_s16 = sphi %s2632_s16, %s4045_s16   ;;  %s2581_s15 = sphi %s2630_s15, %s4044_s15  }
   0x5   : > { %s43_s23 = sadd.s32 1, %s2597_s19  ;;  %s162_s24 = sadd.s32 1, %s2589_s17 }
   0x6   : > { %p45_p0 = scmp.ge.s32.totalorder %s43_s23, 2  ;;  %p172_p1 = scmp.ne.s32.totalorder %s2589_s17, %s2585_s16 }
   0x7   : > { %p173_p2 = scmp.eq.s32.totalorder %s2267_s21, 1  ;;  %p178_p3 = scmp.ne.s32.totalorder %s2585_s16, %s2581_s15 }
   0x8   : > { %s4050_s23 = smov (%p45_p0, %s43_s23), 0  ;;  %p179_p5 = scmp.eq.s32.totalorder %s2268_s22, 1 }
   0x9   : > { %p2670_p4 = por %p173_p2, %p172_p1  ;;  %s155_s26 = ssub.s32 %s2597_s19, %s4050_s23 }
   0xa   : > { %p2274_p6 = scmp.ge.s32.totalorder %s2601_s20, 1  ;;  %p160_p7 = scmp.eq.s32.totalorder %s155_s26, 0 }
   0xb   : > { %p2677_p8 = por %p179_p5, %p178_p3  ;;  %p232_p9 = scmp.lt.s32.totalorder %s2601_s20, 3 }
   0xc   : > { %s2683_s28 = scalar_select %p160_p7, %s2589_s17, %s162_s24  }
   0xd   : > { %p233_p10 = pnand %p2274_p6, %p232_p9 }
   0xf   : > { %236 = sbr.rel (%p233_p10) target bundleno = 768 (0x300), region = 36 }
  0x14   : > { %v2292_v0 = vld [vmem:[%s4011_s1 + $0x1f8] sm:$0xff]  ;;  %v2291_v1 = vld [vmem:[%s4011_s1 + $0x1f0] sm:$0xff]  ;;  %v2290_v2 = vld [vmem:[%s4011_s1 + $0x1e8] sm:$0xff]  ;;  %p275_p11 = scmp.lt.s32.totalorder %s2593_s18, 1  ;;  %s272_s11 = sand.u32 1, %s2585_s16  }
  0x15   : > { %2411 = vmatpush.msra.mxu1 %v2292_v0  ;;  %2412 = vmatpush.msra.mxu2 %v2292_v0  ;;  %v2289_v3 = vld [vmem:[%s4011_s1 + $0x1e0] sm:$0xff]  ;;  %v2288_v4 = vld [vmem:[%s4011_s1 + $0x1d8] sm:$0xff]  ;;  %v2287_v5 = vld [vmem:[%s4011_s1 + $0x1d0] sm:$0xff]  ;;  %s2543_s10 = scalar_lea.hbm %s4014_s4, 512 }
  0x16   : > { %2413 = vmatpush.msra.mxu3 %v2292_v0  ;;  %372 = vmatpush.msra.mxu0 %v2292_v0  ;;  %v2286_v6 = vld [vmem:[%s4011_s1 + $0x1c8] sm:$0xff]  ;;  %v2285_v7 = vld [vmem:[%s4011_s1 + $0x1c0] sm:$0xff]  ;;  %v2284_v8 = vld [vmem:[%s4011_s1 + $0x1b8] sm:$0xff]  ;;  %s276_s9 = scalar_select %p275_p11, %s2593_s18, 1 }
  0x17   : > { %2414 = vmatpush.msra.mxu1 %v2291_v1  ;;  %2415 = vmatpush.msra.mxu2 %v2291_v1  ;;  %v2283_v9 = vld [vmem:[%s4011_s1 + $0x1b0] sm:$0xff]  ;;  %v2282_v10 = vld [vmem:[%s4011_s1 + $0x1a8] sm:$0xff]  ;;  %v2281_v11 = vld [vmem:[%s4011_s1 + $0x1a0] sm:$0xff] }
  0x18   : > { %2416 = vmatpush.msra.mxu3 %v2291_v1  ;;  %373 = vmatpush.msra.mxu0 %v2291_v1  ;;  %v2280_v12 = vld [vmem:[%s4011_s1 + $0x198] sm:$0xff]  ;;  %s2459_s14 = smul.u32 480, %s276_s9  ;;  %v2279_v13 = vld [vmem:[%s4011_s1 + $0x190] sm:$0xff]  ;;  %v2278_v14 = vld [vmem:[%s4011_s1 + $0x188] sm:$0xff] }
  0x19   : > { %2417 = vmatpush.msra.mxu1 %v2290_v2  ;;  %2418 = vmatpush.msra.mxu2 %v2290_v2  ;;  %v2277_v15 = vld [vmem:[%s4011_s1 + $0x180] sm:$0xff]  ;;  %v2308_v18 = vld [vmem:[%s4011_s1 + $0x378] sm:$0xff]  ;;  %v2307_v22 = vld [vmem:[%s4011_s1 + $0x370] sm:$0xff] }
  0x1a   : > { %2419 = vmatpush.msra.mxu3 %v2290_v2  ;;  %374 = vmatpush.msra.mxu0 %v2290_v2  ;;  %s2735_s5 = scalar_lea.vmem %s4010_s0, %s2459_s14  ;;  %v354_v20 = vld [vmem:[%s4011_s1 + $0x78] sm:$0xff]  ;;  %v353_v23 = vld [vmem:[%s4011_s1 + $0x70] sm:$0xff]  ;;  %v2306_v25 = vld [vmem:[%s4011_s1 + $0x368] sm:$0xff]  ;;  %s2275_s14 = sshll.u32 %s272_s11, 8 }
  0x1b   : > { %2420 = vmatpush.msra.mxu1 %v2289_v3  ;;  %2421 = vmatpush.msra.mxu2 %v2289_v3  ;;  %v2741_v16 = vld [vmem:[%s2735_s5 + $0x90] sm:$0xff]  ;;  %v2324_v21 = vld [vmem:[%s4011_s1 + $0xf8] sm:$0xff]  ;;  %v352_v27 = vld [vmem:[%s4011_s1 + $0x68] sm:$0xff]  ;;  %s3759_s21 = scalar_lea.vmem [#allocation3], %s2275_s14 }
  0x1c   : > { %2422 = vmatpush.msra.mxu3 %v2289_v3  ;;  %375 = vmatpush.msra.mxu0 %v2289_v3  ;;  %v2744_v17 = vld [vmem:[%s2735_s5 + $0xf0] sm:$0xff]  ;;  %v2322_v28 = vld [vmem:[%s4011_s1 + $0xe8] sm:$0xff]  ;;  %v2340_v29 = vld [vmem:[%s4011_s1 + $0x278] sm:$0xff]  ;;  %s2136_s29 = sshll.u32 %s3759_s21, 4  ;;  %s2137_s29 = int_to_ptr.vmem [resolvable:$true] %s2136_s29 }
  0x1d   : > { %2423 = vmatpush.msra.mxu1 %v2288_v4  ;;  %2424 = vmatpush.msra.mxu2 %v2288_v4  ;;  %v2750_v19 = vld [vmem:[%s2735_s5 + $0x150] sm:$0xff]  ;;  %v2786_v30 = vld [vmem:[%s2735_s5 + $0x98] sm:$0xff]  ;;  %v2305_v32 = vld [vmem:[%s4011_s1 + $0x360] sm:$0xff] }
  0x1e   : > { %2425 = vmatpush.msra.mxu3 %v2288_v4  ;;  %376 = vmatpush.msra.mxu0 %v2288_v4  ;;  %v2323_v24 = vld [vmem:[%s4011_s1 + $0xf0] sm:$0xff]  ;;  %v2789_v31 = vld [vmem:[%s2735_s5 + $0xf8] sm:$0xff]  ;;  %v2321_v33 = vld [vmem:[%s4011_s1 + $0xe0] sm:$0xff] }
  0x1f   : > { %2426 = vmatpush.msra.mxu1 %v2287_v5  ;;  %2427 = vmatpush.msra.mxu2 %v2287_v5  ;;  %v2774_v26 = vld [vmem:[%s2735_s5 + $0x30] sm:$0xff]  ;;  %v2799_v34 = vld [vmem:[%s2735_s5 + $0x158] sm:$0xff]  ;;  %v351_v36 = vld [vmem:[%s4011_s1 + $0x60] sm:$0xff] }
  0x20   : > { %2428 = vmatpush.msra.mxu3 %v2287_v5  ;;  %377 = vmatpush.msra.mxu0 %v2287_v5  ;;  %v2339_v35 = vld [vmem:[%s4011_s1 + $0x270] sm:$0xff]  ;;  %v2304_v37 = vld [vmem:[%s4011_s1 + $0x358] sm:$0xff]  ;;  %v2338_v39 = vld [vmem:[%s4011_s1 + $0x268] sm:$0xff] }
  0x21   : > { %2429 = vmatpush.msra.mxu1 %v2286_v6  ;;  %2430 = vmatpush.msra.mxu2 %v2286_v6  ;;  %v2320_v38 = vld [vmem:[%s4011_s1 + $0xd8] sm:$0xff]  ;;  %v2303_v41 = vld [vmem:[%s4011_s1 + $0x350] sm:$0xff]  ;;  %v2337_v44 = vld [vmem:[%s4011_s1 + $0x260] sm:$0xff] }
  0x22   : > { %2431 = vmatpush.msra.mxu3 %v2286_v6  ;;  %378 = vmatpush.msra.mxu0 %v2286_v6  ;;  %v350_v40 = vld [vmem:[%s4011_s1 + $0x58] sm:$0xff]  ;;  %v2319_v43 = vld [vmem:[%s4011_s1 + $0xd0] sm:$0xff]  ;;  %v2838_v46 = vld [vmem:[%s2735_s5 + $0xa8] sm:$0xff] }
  0x23   : > { %2432 = vmatpush.msra.mxu1 %v2285_v7  ;;  %2433 = vmatpush.msra.mxu2 %v2285_v7  ;;  %v2826_v42 = vld [vmem:[%s2735_s5 + $0x38] sm:$0xff]  ;;  %v349_v45 = vld [vmem:[%s4011_s1 + $0x50] sm:$0xff]  ;;  %v2841_v47 = vld [vmem:[%s2735_s5 + $0x108] sm:$0xff] }
  0x24   : > { %2434 = vmatpush.msra.mxu3 %v2285_v7  ;;  %379 = vmatpush.msra.mxu0 %v2285_v7  ;;  %v2302_v48 = vld [vmem:[%s4011_s1 + $0x348] sm:$0xff]  ;;  %v2336_v51 = vld [vmem:[%s4011_s1 + $0x258] sm:$0xff]  ;;  %v2301_v53 = vld [vmem:[%s4011_s1 + $0x340] sm:$0xff] }
  0x25   : > { %2435 = vmatpush.msra.mxu1 %v2284_v8  ;;  %2436 = vmatpush.msra.mxu2 %v2284_v8  ;;  %v2318_v49 = vld [vmem:[%s4011_s1 + $0xc8] sm:$0xff]  ;;  %v2317_v54 = vld [vmem:[%s4011_s1 + $0xc0] sm:$0xff]  ;;  %v2335_v55 = vld [vmem:[%s4011_s1 + $0x250] sm:$0xff] }
  0x26   : > { %2437 = vmatpush.msra.mxu3 %v2284_v8  ;;  %380 = vmatpush.msra.mxu0 %v2284_v8  ;;  %v2851_v50 = vld [vmem:[%s2735_s5 + $0x168] sm:$0xff]  ;;  %v347_v56 = vld [vmem:[%s4011_s1 + $0x40] sm:$0xff]  ;;  %v2300_v57 = vld [vmem:[%s4011_s1 + $0x338] sm:$0xff] }
  0x27   : > { %2438 = vmatpush.msra.mxu1 %v2283_v9  ;;  %2439 = vmatpush.msra.mxu2 %v2283_v9  ;;  %v348_v52 = vld [vmem:[%s4011_s1 + $0x48] sm:$0xff]  ;;  %v2316_v59 = vld [vmem:[%s4011_s1 + $0xb8] sm:$0xff]  ;;  %v2890_v62 = vld [vmem:[%s2735_s5 + $0xb0] sm:$0xff] }
  0x28   : > { %2440 = vmatpush.msra.mxu3 %v2283_v9  ;;  %381 = vmatpush.msra.mxu0 %v2283_v9  ;;  %v2878_v58 = vld [vmem:[%s2735_s5 + $0x48] sm:$0xff]  ;;  %v346_v61 = vld [vmem:[%s4011_s1 + $0x38] sm:$0xff]  ;;  %v2893_v63 = vld [vmem:[%s2735_s5 + $0x110] sm:$0xff] }
  0x29   : > { %2441 = vmatpush.msra.mxu1 %v2282_v10  ;;  %2442 = vmatpush.msra.mxu2 %v2282_v10  ;;  %v2334_v60 = vld [vmem:[%s4011_s1 + $0x248] sm:$0xff]  ;;  %v2299_v0 = vld [vmem:[%s4011_s1 + $0x330] sm:$0xff]  ;;  %v2333_v3 = vld [vmem:[%s4011_s1 + $0x240] sm:$0xff] }
  0x2a   : > { %2443 = vmatpush.msra.mxu3 %v2282_v10  ;;  %382 = vmatpush.msra.mxu0 %v2282_v10  ;;  %v2315_v1 = vld [vmem:[%s4011_s1 + $0xb0] sm:$0xff]  ;;  %v2298_v5 = vld [vmem:[%s4011_s1 + $0x328] sm:$0xff]  ;;  %v2332_v7 = vld [vmem:[%s4011_s1 + $0x238] sm:$0xff] }
  0x2b   : > { %2444 = vmatpush.msra.mxu1 %v2281_v11  ;;  %2445 = vmatpush.msra.mxu2 %v2281_v11  ;;  %v2903_v2 = vld [vmem:[%s2735_s5 + $0x170] sm:$0xff]  ;;  %v2314_v6 = vld [vmem:[%s4011_s1 + $0xa8] sm:$0xff]  ;;  %v2297_v9 = vld [vmem:[%s4011_s1 + $0x320] sm:$0xff] }
  0x2c   : > { %2446 = vmatpush.msra.mxu3 %v2281_v11  ;;  %383 = vmatpush.msra.mxu0 %v2281_v11  ;;  %v345_v4 = vld [vmem:[%s4011_s1 + $0x30] sm:$0xff]  ;;  %v344_v8 = vld [vmem:[%s4011_s1 + $0x28] sm:$0xff]  ;;  %v2313_v11 = vld [vmem:[%s4011_s1 + $0xa0] sm:$0xff] }
  0x2d   : > { %2447 = vmatpush.msra.mxu1 %v2280_v12  ;;  %2448 = vmatpush.msra.mxu2 %v2280_v12  ;;  %v2930_v10 = vld [vmem:[%s2735_s5 + $0x50] sm:$0xff] }
  0x2e   : > { %2449 = vmatpush.msra.mxu3 %v2280_v12  ;;  %384 = vmatpush.msra.mxu0 %v2280_v12  ;;  %v2331_v12 = vld [vmem:[%s4011_s1 + $0x230] sm:$0xff] }
  0x2f   : > { %2450 = vmatpush.msra.mxu1 %v2279_v13  ;;  %2451 = vmatpush.msra.mxu2 %v2279_v13 }
  0x30   : > { %2452 = vmatpush.msra.mxu3 %v2279_v13  ;;  %385 = vmatpush.msra.mxu0 %v2279_v13  ;;  %v343_v13 = vld [vmem:[%s4011_s1 + $0x20] sm:$0xff] }
  0x31   : > { %2453 = vmatpush.msra.mxu1 %v2278_v14  ;;  %2454 = vmatpush.msra.mxu2 %v2278_v14 }
  0x32   : > { %2455 = vmatpush.msra.mxu3 %v2278_v14  ;;  %386 = vmatpush.msra.mxu0 %v2278_v14  ;;  %v2942_v14 = vld [vmem:[%s2735_s5 + $0xc0] sm:$0xff] }
  0x33   : > { %2456 = vmatpush.msra.mxu1 %v2277_v15  ;;  %2457 = vmatpush.msra.mxu2 %v2277_v15 }
  0x34   : > { %412 = vmatmul.f32.vlgmr.msra.gmra.mxu1 %v2741_v16  ;;  %436 = vmatmul.f32.vlgmr.msra.gmra.mxu2 %v2744_v17 }
  0x35   : > { %615 = vmatpush.msrb.mxu2 %v2308_v18  ;;  %2458 = vmatpush.msra.mxu3 %v2277_v15  ;;  %v2296_v18 = vld [vmem:[%s4011_s1 + $0x318] sm:$0xff] }
  0x36   : > { %460 = vmatmul.f32.vlgmr.msra.gmra.mxu3 %v2750_v19  ;;  %485 = vmatpush.msrb.mxu1 %v354_v20  ;;  %v2312_v20 = vld [vmem:[%s4011_s1 + $0x98] sm:$0xff] }
  0x37   : > { %817 = vmatpush.msrb.mxu3 %v2324_v21  ;;  %616 = vmatpush.msrb.mxu2 %v2307_v22  ;;  %v2955_v21 = vld [vmem:[%s2735_s5 + $0x180] sm:$0xff]  ;;  %v2330_v22 = vld [vmem:[%s4011_s1 + $0x228] sm:$0xff] }
  0x38   : > { %486 = vmatpush.msrb.mxu1 %v353_v23  ;;  %387 = vmatpush.msra.mxu0 %v2277_v15  ;;  %v2945_v15 = vld [vmem:[%s2735_s5 + $0x120] sm:$0xff]  ;;  %v342_v23 = vld [vmem:[%s4011_s1 + $0x18] sm:$0xff] }
  0x39   : > { %818 = vmatpush.msrb.mxu3 %v2323_v24  ;;  %617 = vmatpush.msrb.mxu2 %v2306_v25  ;;  %v2295_v24 = vld [vmem:[%s4011_s1 + $0x310] sm:$0xff] }
  0x3a   : > { %388 = vmatmul.f32.vlgmr.msra.gmra.mxu0 %v2774_v26  ;;  %487 = vmatpush.msrb.mxu1 %v352_v27  ;;  %v2311_v25 = vld [vmem:[%s4011_s1 + $0x90] sm:$0xff]  ;;  %v2329_v27 = vld [vmem:[%s4011_s1 + $0x220] sm:$0xff] }
  0x3b   : > { %819 = vmatpush.msrb.mxu3 %v2322_v28  ;;  %979 = vmatpush.msrb.mxu0 %v2340_v29  ;;  %v341_v28 = vld [vmem:[%s4011_s1 + $0x10] sm:$0xff]  ;;  %v2294_v29 = vld [vmem:[%s4011_s1 + $0x308] sm:$0xff] }
  0x3c   : > { %415 = vmatmul.f32.gmra.mxu1 %v2786_v30  ;;  %439 = vmatmul.f32.gmra.mxu2 %v2789_v31 }
  0x3d   : > { %618 = vmatpush.msrb.mxu2 %v2305_v32  ;;  %820 = vmatpush.msrb.mxu3 %v2321_v33  ;;  %v2982_v32 = vld [vmem:[%s2735_s5 + $0x60] sm:$0xff]  ;;  %v2310_v33 = vld [vmem:[%s4011_s1 + $0x88] sm:$0xff] }
  0x3e   : > { %463 = vmatmul.f32.gmra.mxu3 %v2799_v34  ;;  %980 = vmatpush.msrb.mxu0 %v2339_v35  ;;  %v2328_v35 = vld [vmem:[%s4011_s1 + $0x218] sm:$0xff] }
  0x3f   : > { %488 = vmatpush.msrb.mxu1 %v351_v36  ;;  %619 = vmatpush.msrb.mxu2 %v2304_v37  ;;  %v340_v36 = vld [vmem:[%s4011_s1 + $0x8] sm:$0xff] }
  0x40   : > { %821 = vmatpush.msrb.mxu3 %v2320_v38  ;;  %981 = vmatpush.msrb.mxu0 %v2338_v39  ;;  %v2994_v37 = vld [vmem:[%s2735_s5 + $0xc8] sm:$0xff]  ;;  %v2293_v39 = vld [vmem:[%s4011_s1 + $0x300] sm:$0xff] }
  0x41   : > { %489 = vmatpush.msrb.mxu1 %v350_v40  ;;  %620 = vmatpush.msrb.mxu2 %v2303_v41  ;;  %v2997_v38 = vld [vmem:[%s2735_s5 + $0x128] sm:$0xff]  ;;  %v2309_v40 = vld [vmem:[%s4011_s1 + $0x80] sm:$0xff] }
  0x42   : > { %391 = vmatmul.f32.gmra.mxu0 %v2826_v42  ;;  %822 = vmatpush.msrb.mxu3 %v2319_v43  ;;  %v3007_v41 = vld [vmem:[%s2735_s5 + $0x188] sm:$0xff]  ;;  %v2327_v43 = vld [vmem:[%s4011_s1 + $0x210] sm:$0xff] }
  0x43   : > { %982 = vmatpush.msrb.mxu0 %v2337_v44  ;;  %490 = vmatpush.msrb.mxu1 %v349_v45  ;;  %v339_v44 = vld [vmem:[%s4011_s1] sm:$0xff]  ;;  %v2372_v45 = vld [vmem:[%s4011_s1 + $0x178] sm:$0xff] }
  0x44   : > { %418 = vmatmul.f32.gmra.mxu1 %v2838_v46  ;;  %442 = vmatmul.f32.gmra.mxu2 %v2841_v47 }
  0x45   : > { %621 = vmatpush.msrb.mxu2 %v2302_v48  ;;  %823 = vmatpush.msrb.mxu3 %v2318_v49  ;;  %v2326_v48 = vld [vmem:[%s4011_s1 + $0x208] sm:$0xff]  ;;  %v2388_v49 = vld [vmem:[%s4011_s1 + $0x2f8] sm:$0xff] }
  0x46   : > { %466 = vmatmul.f32.gmra.mxu3 %v2851_v50  ;;  %983 = vmatpush.msrb.mxu0 %v2336_v51  ;;  %v2356_v51 = vld [vmem:[%s4011_s1 + $0x3f8] sm:$0xff] }
  0x47   : > { %491 = vmatpush.msrb.mxu1 %v348_v52  ;;  %622 = vmatpush.msrb.mxu2 %v2301_v53  ;;  %v3031_v52 = vld [vmem:[%s2735_s5 + $0x68] sm:$0xff]  ;;  %v2325_v53 = vld [vmem:[%s4011_s1 + $0x200] sm:$0xff] }
  0x48   : > { %824 = vmatpush.msrb.mxu3 %v2317_v54  ;;  %984 = vmatpush.msrb.mxu0 %v2335_v55  ;;  %v3037_v54 = vld [vmem:[%s2735_s5 + $0xd8] sm:$0xff] }
  0x49   : > { %492 = vmatpush.msrb.mxu1 %v347_v56  ;;  %623 = vmatpush.msrb.mxu2 %v2300_v57  ;;  %v3040_v55 = vld [vmem:[%s2735_s5 + $0x138] sm:$0xff] }
  0x4a   : > { %394 = vmatmul.f32.gmra.mxu0 %v2878_v58  ;;  %825 = vmatpush.msrb.mxu3 %v2316_v59  ;;  %v2404_v56 = vld [vmem:[%s4011_s1 + $0x478] sm:$0xff]  ;;  %v2371_v59 = vld [vmem:[%s4011_s1 + $0x170] sm:$0xff] }
  0x4b   : > { %985 = vmatpush.msrb.mxu0 %v2334_v60  ;;  %493 = vmatpush.msrb.mxu1 %v346_v61  ;;  %v3047_v57 = vld [vmem:[%s2735_s5 + $0x198] sm:$0xff]  ;;  %v2387_v60 = vld [vmem:[%s4011_s1 + $0x2f0] sm:$0xff] }
  0x4c   : > { %421 = vmatmul.f32.gmra.mxu1 %v2890_v62  ;;  %445 = vmatmul.f32.gmra.mxu2 %v2893_v63  ;;  %v2355_v61 = vld [vmem:[%s4011_s1 + $0x3f0] sm:$0xff] }
  0x4d   : > { %624 = vmatpush.msrb.mxu2 %v2299_v0  ;;  %826 = vmatpush.msrb.mxu3 %v2315_v1  ;;  %v3062_v0 = vld [vmem:[%s2735_s5 + $0x78] sm:$0xff]  ;;  %v3065_v1 = vld [vmem:[%s2735_s5 + $0xe0] sm:$0xff] }
  0x4e   : > { %469 = vmatmul.f32.gmra.mxu3 %v2903_v2  ;;  %986 = vmatpush.msrb.mxu0 %v2333_v3  ;;  %v3068_v3 = vld [vmem:[%s2735_s5 + $0x140] sm:$0xff] }
  0x4f   : > { %494 = vmatpush.msrb.mxu1 %v345_v4  ;;  %625 = vmatpush.msrb.mxu2 %v2298_v5  ;;  %v3072_v4 = vld [vmem:[%s2735_s5 + $0x1a0] sm:$0xff]  ;;  %v2403_v5 = vld [vmem:[%s4011_s1 + $0x470] sm:$0xff] }
  0x50   : > { %827 = vmatpush.msrb.mxu3 %v2314_v6  ;;  %987 = vmatpush.msrb.mxu0 %v2332_v7  ;;  %v3081_v6 = vld [vmem:[%s2735_s5 + $0x80] sm:$0xff] }
  0x51   : > { %495 = vmatpush.msrb.mxu1 %v344_v8  ;;  %626 = vmatpush.msrb.mxu2 %v2297_v9  ;;  %v299_v7 = vld [vmem:[%s2735_s5] sm:$0xff]  ;;  %v2370_v9 = vld [vmem:[%s4011_s1 + $0x168] sm:$0xff] }
  0x52   : > { %397 = vmatmul.f32.gmra.mxu0 %v2930_v10  ;;  %828 = vmatpush.msrb.mxu3 %v2313_v11  ;;  %v760_v8 = vld [vmem:[%s2735_s5 + $0x2] sm:$0xff] }
  0x53   : > { %988 = vmatpush.msrb.mxu0 %v2331_v12  ;;  %496 = vmatpush.msrb.mxu1 %v343_v13  ;;  %v2386_v11 = vld [vmem:[%s4011_s1 + $0x2e8] sm:$0xff]  ;;  %v764_v13 = vld [vmem:[%s2735_s5 + $0x32] sm:$0xff] }
  0x54   : > { %424 = vmatmul.f32.gmra.mxu1 %v2942_v14  ;;  %448 = vmatmul.f32.gmra.mxu2 %v2945_v15  ;;  %v2354_v12 = vld [vmem:[%s4011_s1 + $0x3e8] sm:$0xff] }
  0x55   : > { %627 = vmatpush.msrb.mxu2 %v2296_v18  ;;  %829 = vmatpush.msrb.mxu3 %v2312_v20  ;;  %v300_v18 = vld [vmem:[%s2735_s5 + $0x8] sm:$0xff] }
  0x56   : > { %472 = vmatmul.f32.gmra.mxu3 %v2955_v21  ;;  %989 = vmatpush.msrb.mxu0 %v2330_v22  ;;  %v761_v20 = vld [vmem:[%s2735_s5 + $0xa] sm:$0xff] }
  0x57   : > { %497 = vmatpush.msrb.mxu1 %v342_v23  ;;  %628 = vmatpush.msrb.mxu2 %v2295_v24  ;;  %v2402_v22 = vld [vmem:[%s4011_s1 + $0x468] sm:$0xff]  ;;  %v765_v23 = vld [vmem:[%s2735_s5 + $0x3a] sm:$0xff] }
  0x58   : > { %830 = vmatpush.msrb.mxu3 %v2311_v25  ;;  %990 = vmatpush.msrb.mxu0 %v2329_v27  ;;  %v301_v24 = vld [vmem:[%s2735_s5 + $0x18] sm:$0xff]  ;;  %v2369_v27 = vld [vmem:[%s4011_s1 + $0x160] sm:$0xff] }
  0x59   : > { %498 = vmatpush.msrb.mxu1 %v341_v28  ;;  %629 = vmatpush.msrb.mxu2 %v2294_v29  ;;  %v762_v25 = vld [vmem:[%s2735_s5 + $0x1a] sm:$0xff] }
  0x5a   : > { %400 = vmatmul.f32.gmra.mxu0 %v2982_v32  ;;  %831 = vmatpush.msrb.mxu3 %v2310_v33  ;;  %v2385_v28 = vld [vmem:[%s4011_s1 + $0x2e0] sm:$0xff]  ;;  %v766_v33 = vld [vmem:[%s2735_s5 + $0x4a] sm:$0xff] }
  0x5b   : > { %991 = vmatpush.msrb.mxu0 %v2328_v35  ;;  %499 = vmatpush.msrb.mxu1 %v340_v36  ;;  %v2353_v29 = vld [vmem:[%s4011_s1 + $0x3e0] sm:$0xff] }
  0x5c   : > { %427 = vmatmul.f32.gmra.mxu1 %v2994_v37  ;;  %451 = vmatmul.f32.gmra.mxu2 %v2997_v38  ;;  %v302_v35 = vld [vmem:[%s2735_s5 + $0x20] sm:$0xff] }
  0x5d   : > { %630 = vmatpush.msrb.mxu2 %v2293_v39  ;;  %832 = vmatpush.msrb.mxu3 %v2309_v40  ;;  %v763_v36 = vld [vmem:[%s2735_s5 + $0x22] sm:$0xff]  ;;  %v767_v40 = vld [vmem:[%s2735_s5 + $0x52] sm:$0xff] }
  0x5e   : > { %475 = vmatmul.f32.gmra.mxu3 %v3007_v41  ;;  %992 = vmatpush.msrb.mxu0 %v2327_v43  ;;  %v2401_v39 = vld [vmem:[%s4011_s1 + $0x460] sm:$0xff]  ;;  %v2368_v43 = vld [vmem:[%s4011_s1 + $0x158] sm:$0xff] }
  0x5f   : > { %500 = vmatpush.msrb.mxu1 %v339_v44  ;;  %1343 = vmatpush.msra.mxu2 %v2372_v45  ;;  %v2384_v44 = vld [vmem:[%s4011_s1 + $0x2d8] sm:$0xff]  ;;  %v3133_v45 = vld [vmem:[%s2735_s5 + $0x62] sm:$0xff] }
  0x60   : > { %993 = vmatpush.msrb.mxu0 %v2326_v48  ;;  %1505 = vmatpush.msra.mxu3 %v2388_v49  ;;  %v2352_v48 = vld [vmem:[%s4011_s1 + $0x3d8] sm:$0xff]  ;;  %v3145_v49 = vld [vmem:[%s2735_s5 + $0x6a] sm:$0xff] }
  0x61   : > { %1141 = vmatpush.msra.mxu1 %v2356_v51  ;;  %1344 = vmatpush.msra.mxu2 %v2371_v59  ;;  %v2383_v51 = vld [vmem:[%s4011_s1 + $0x2d0] sm:$0xff]  ;;  %v3169_v59 = vld [vmem:[%s2735_s5 + $0x82] sm:$0xff] }
  0x62   : > { %403 = vmatmul.f32.gmra.mxu0 %v3031_v52  ;;  %1506 = vmatpush.msra.mxu3 %v2387_v60 }
  0x63   : > { %994 = vmatpush.msrb.mxu0 %v2325_v53  ;;  %1142 = vmatpush.msra.mxu1 %v2355_v61  ;;  %v3157_v53 = vld [vmem:[%s2735_s5 + $0x7a] sm:$0xff]  ;;  %v2382_v61 = vld [vmem:[%s4011_s1 + $0x2c8] sm:$0xff] }
  0x64   : > { %430 = vmatmul.f32.gmra.mxu1 %v3037_v54  ;;  %454 = vmatmul.f32.gmra.mxu2 %v3040_v55 }
  0x65   : > { %1667 = vmatpush.msra.mxu0 %v2404_v56  ;;  %1345 = vmatpush.msra.mxu2 %v2370_v9  ;;  %v2351_v56 = vld [vmem:[%s4011_s1 + $0x3d0] sm:$0xff] }
  0x66   : > { %478 = vmatmul.f32.gmra.mxu3 %v3047_v57  ;;  %1143 = vmatpush.msra.mxu1 %v2354_v12  ;;  %v2398_v12 = vld [vmem:[%s4011_s1 + $0x448] sm:$0xff] }
  0x67   : > { %1668 = vmatpush.msra.mxu0 %v2403_v5  ;;  %1507 = vmatpush.msra.mxu3 %v2386_v11 }
  0x68   : > { %1346 = vmatpush.msra.mxu2 %v2369_v27  ;;  %1144 = vmatpush.msra.mxu1 %v2353_v29 }
  0x69   : > { %1669 = vmatpush.msra.mxu0 %v2402_v22  ;;  %1508 = vmatpush.msra.mxu3 %v2385_v28  ;;  %v3230_v28 = vld [vmem:[%s2735_s5 + $0xaa] sm:$0xff] }
  0x6a   : > { %406 = vmatmul.f32.gmra.mxu0 %v3062_v0  ;;  %1347 = vmatpush.msra.mxu2 %v2368_v43 }
  0x6b   : > { %1670 = vmatpush.msra.mxu0 %v2401_v39  ;;  %1509 = vmatpush.msra.mxu3 %v2384_v44 }
  0x6c   : > { %433 = vmatmul.f32.gmra.mxu1 %v3065_v1  ;;  %457 = vmatmul.f32.gmra.mxu2 %v3068_v3 }
  0x6d   : > { %1145 = vmatpush.msra.mxu1 %v2352_v48  ;;  %1510 = vmatpush.msra.mxu3 %v2383_v51  ;;  %v2380_v48 = vld [vmem:[%s4011_s1 + $0x2b8] sm:$0xff]  ;;  %v3272_v51 = vld [vmem:[%s2735_s5 + $0xc2] sm:$0xff] }
  0x6e   : > { %481 = vmatmul.f32.gmra.mxu3 %v3072_v4  ;;  %4022 = vst [vmem:[#allocation10_spill] sm:$0xff] %v3272_v51 }
  0x6f   : > { %1146 = vmatpush.msra.mxu1 %v2351_v56  ;;  %1511 = vmatpush.msra.mxu3 %v2382_v61 }
  0x72   : > { %409 = vmatmul.f32.gmra.mxu0 %v3081_v6 }
  0x74   : > { %501 = vmatmul.f32.vlgmr.msrb.gmra.mxu1 %v299_v7  ;;  %631 = vmatmul.f32.vlgmr.msrb.gmra.mxu2 %v2982_v32 }
  0x76   : > { %833 = vmatmul.f32.vlgmr.msrb.gmra.mxu3 %v760_v8  ;;  %v3188_v8 = vld [vmem:[%s2735_s5 + $0x92] sm:$0xff] }
  0x7a   : > { %995 = vmatmul.f32.vlgmr.msrb.gmra.mxu0 %v764_v13 }
  0x7c   : > { %504 = vmatmul.f32.gmra.mxu1 %v300_v18  ;;  %634 = vmatmul.f32.gmra.mxu2 %v3031_v52 }
  0x7e   : > { %836 = vmatmul.f32.gmra.mxu3 %v761_v20  ;;  %v3209_v20 = vld [vmem:[%s2735_s5 + $0x9a] sm:$0xff] }
  0x82   : > { %998 = vmatmul.f32.gmra.mxu0 %v765_v23 }
  0x84   : > { %507 = vmatmul.f32.gmra.mxu1 %v301_v24  ;;  %637 = vmatmul.f32.gmra.mxu2 %v3062_v0  ;;  %v2381_v24 = vld [vmem:[%s4011_s1 + $0x2c0] sm:$0xff] }
  0x85   : > { %1512 = vmatpush.msra.mxu3 %v2381_v24 }
  0x86   : > { %839 = vmatmul.f32.gmra.mxu3 %v762_v25 }
  0x87   : > { %1513 = vmatpush.msra.mxu3 %v2380_v48  ;;  %v3314_v48 = vld [vmem:[%s2735_s5 + $0xda] sm:$0xff] }
  0x8a   : > { %1001 = vmatmul.f32.gmra.mxu0 %v766_v33 }
  0x8c   : > { %510 = vmatmul.f32.gmra.mxu1 %v302_v35  ;;  %640 = vmatmul.f32.gmra.mxu2 %v3081_v6  ;;  %v2397_v35 = vld [vmem:[%s4011_s1 + $0x440] sm:$0xff] }
  0x8e   : > { %842 = vmatmul.f32.gmra.mxu3 %v763_v36 }
  0x92   : > { %1004 = vmatmul.f32.gmra.mxu0 %v767_v40 }
  0x94   : > { %513 = vmatmul.f32.gmra.mxu1 %v2774_v26  ;;  %643 = vmatmul.f32.gmra.mxu2 %v2741_v16  ;;  %v2400_v26 = vld [vmem:[%s4011_s1 + $0x458] sm:$0xff] }
  0x95   : > { %1671 = vmatpush.msra.mxu0 %v2400_v26 }
  0x96   : > { %845 = vmatmul.f32.gmra.mxu3 %v764_v13 }
  0x9a   : > { %1007 = vmatmul.f32.gmra.mxu0 %v3133_v45 }
  0x9c   : > { %516 = vmatmul.f32.gmra.mxu1 %v2826_v42  ;;  %646 = vmatmul.f32.gmra.mxu2 %v2786_v30  ;;  %v2367_v42 = vld [vmem:[%s4011_s1 + $0x150] sm:$0xff] }
  0x9d   : > { %1348 = vmatpush.msra.mxu2 %v2367_v42 }
  0x9e   : > { %848 = vmatmul.f32.gmra.mxu3 %v765_v23 }
  0xa2   : > { %1010 = vmatmul.f32.gmra.mxu0 %v3145_v49 }
  0xa4   : > { %519 = vmatmul.f32.gmra.mxu1 %v2878_v58  ;;  %649 = vmatmul.f32.gmra.mxu2 %v2838_v46  ;;  %v2399_v58 = vld [vmem:[%s4011_s1 + $0x450] sm:$0xff] }
  0xa5   : > { %1672 = vmatpush.msra.mxu0 %v2399_v58 }
  0xa6   : > { %851 = vmatmul.f32.gmra.mxu3 %v766_v33 }
  0xa7   : > { %1673 = vmatpush.msra.mxu0 %v2398_v12  ;;  %v3293_v12 = vld [vmem:[%s2735_s5 + $0xca] sm:$0xff] }
  0xa9   : > { %1674 = vmatpush.msra.mxu0 %v2397_v35 }
  0xaa   : > { %1013 = vmatmul.f32.gmra.mxu0 %v3157_v53 }
  0xac   : > { %522 = vmatmul.f32.gmra.mxu1 %v2930_v10  ;;  %652 = vmatmul.f32.gmra.mxu2 %v2890_v62  ;;  %v2366_v10 = vld [vmem:[%s4011_s1 + $0x148] sm:$0xff] }
  0xad   : > { %1349 = vmatpush.msra.mxu2 %v2366_v10  ;;  %v2396_v10 = vld [vmem:[%s4011_s1 + $0x438] sm:$0xff] }
  0xae   : > { %854 = vmatmul.f32.gmra.mxu3 %v767_v40  ;;  %v3251_v40 = vld [vmem:[%s2735_s5 + $0xb2] sm:$0xff]  ;;  %1675 = vmatpush.msra.mxu0 %v2396_v10 }
  0xb1   : > { %v3171_v60 = vpop.f32.mrf.mxu1 }
  0xb2   : > { %1016 = vmatmul.f32.gmra.mxu0 %v3169_v59 }
  0xb4   : > { %525 = vmatmul.f32.gmra.mxu1 %v2982_v32  ;;  %655 = vmatmul.f32.gmra.mxu2 %v2942_v14  ;;  %v2350_v32 = vld [vmem:[%s4011_s1 + $0x3c8] sm:$0xff] }
  0xb5   : > { %1147 = vmatpush.msra.mxu1 %v2350_v32 }
  0xb6   : > { %857 = vmatmul.f32.gmra.mxu3 %v3133_v45 }
  0xb7   : > { %v3183_v5 = vpop.f32.mrf.mxu2  ;;  %v3185_v7 = vpop.f32.mrf.mxu0 }
  0xb9   : > { %v3193_v9 = vpop.f32.mrf.mxu1  ;;  %v3195_v11 = vpop.f32.mrf.mxu3 }
  0xba   : > { %4018 = vst [vmem:[#allocation6_spill] sm:$0xff] %v3195_v11  ;;  %1019 = vmatmul.f32.gmra.mxu0 %v3188_v8  ;;  %v2346_v11 = vld [vmem:[%s4011_s1 + $0x3a8] sm:$0xff] }
  0xbc   : > { %528 = vmatmul.f32.gmra.mxu1 %v3031_v52  ;;  %658 = vmatmul.f32.gmra.mxu2 %v2994_v37  ;;  %v2365_v52 = vld [vmem:[%s4011_s1 + $0x140] sm:$0xff] }
  0xbd   : > { %1350 = vmatpush.msra.mxu2 %v2365_v52 }
  0xbe   : > { %860 = vmatmul.f32.gmra.mxu3 %v3145_v49 }
  0xbf   : > { %v3204_v13 = vpop.f32.mrf.mxu2  ;;  %v3206_v18 = vpop.f32.mrf.mxu0 }
  0xc1   : > { %v3211_v22 = vpop.f32.mrf.mxu1  ;;  %v3213_v23 = vpop.f32.mrf.mxu3 }
  0xc2   : > { %4019 = vst [vmem:[#allocation7_spill] sm:$0xff] %v3213_v23  ;;  %1022 = vmatmul.f32.gmra.mxu0 %v3209_v20  ;;  %v3351_v23 = vld [vmem:[%s2735_s5 + $0xf2] sm:$0xff] }
  0xc4   : > { %531 = vmatmul.f32.gmra.mxu1 %v3062_v0  ;;  %661 = vmatmul.f32.gmra.mxu2 %v3037_v54  ;;  %v2349_v0 = vld [vmem:[%s4011_s1 + $0x3c0] sm:$0xff] }
  0xc5   : > { %1148 = vmatpush.msra.mxu1 %v2349_v0  ;;  %v2379_v0 = vld [vmem:[%s4011_s1 + $0x2b0] sm:$0xff] }
  0xc6   : > { %863 = vmatmul.f32.gmra.mxu3 %v3157_v53 }
  0xc7   : > { %v3225_v25 = vpop.f32.mrf.mxu2  ;;  %v3227_v27 = vpop.f32.mrf.mxu0  ;;  %1514 = vmatpush.msra.mxu3 %v2379_v0 }
  0xc9   : > { %v3235_v29 = vpop.f32.mrf.mxu1  ;;  %v3237_v33 = vpop.f32.mrf.mxu3 }
  0xca   : > { %4020 = vst [vmem:[#allocation8_spill] sm:$0xff] %v3237_v33  ;;  %1025 = vmatmul.f32.gmra.mxu0 %v3230_v28 }
  0xcc   : > { %534 = vmatmul.f32.gmra.mxu1 %v3081_v6  ;;  %664 = vmatmul.f32.gmra.mxu2 %v3065_v1  ;;  %v2364_v6 = vld [vmem:[%s4011_s1 + $0x138] sm:$0xff] }
  0xcd   : > { %1351 = vmatpush.msra.mxu2 %v2364_v6 }
  0xce   : > { %866 = vmatmul.f32.gmra.mxu3 %v3169_v59 }
  0xcf   : > { %v3246_v36 = vpop.f32.mrf.mxu2  ;;  %v3248_v39 = vpop.f32.mrf.mxu0 }
  0xd1   : > { %v3253_v43 = vpop.f32.mrf.mxu1  ;;  %v3255_v44 = vpop.f32.mrf.mxu3 }
  0xd2   : > { %4021 = vst [vmem:[#allocation9_spill] sm:$0xff] %v3255_v44  ;;  %1028 = vmatmul.f32.gmra.mxu0 %v3251_v40 }
  0xd4   : > { %537 = vmatmul.f32.gmra.mxu1 %v2741_v16  ;;  %667 = vmatmul.f32.gmra.mxu2 %v2744_v17  ;;  %v2348_v16 = vld [vmem:[%s4011_s1 + $0x3b8] sm:$0xff] }
  0xd5   : > { %1149 = vmatpush.msra.mxu1 %v2348_v16 }
  0xd6   : > { %869 = vmatmul.f32.gmra.mxu3 %v3188_v8 }
  0xd7   : > { %v3267_v26 = vpop.f32.mrf.mxu2  ;;  %v3269_v42 = vpop.f32.mrf.mxu0 }
  0xd9   : > { %v3277_v56 = vpop.f32.mrf.mxu1  ;;  %v3279_v58 = vpop.f32.mrf.mxu3 }
  0xda   : > { %4023 = vst [vmem:[#allocation11_spill] sm:$0xff] %v3279_v58  ;;  %1031 = vmatmul.f32.gmra.mxu0 %v3272_v51  ;;  %v3335_v58 = vld [vmem:[%s2735_s5 + $0xe2] sm:$0xff] }
  0xdc   : > { %540 = vmatmul.f32.gmra.mxu1 %v2786_v30  ;;  %670 = vmatmul.f32.gmra.mxu2 %v2789_v31  ;;  %v2363_v30 = vld [vmem:[%s4011_s1 + $0x130] sm:$0xff] }
  0xdd   : > { %1352 = vmatpush.msra.mxu2 %v2363_v30  ;;  %v2395_v30 = vld [vmem:[%s4011_s1 + $0x430] sm:$0xff] }
  0xde   : > { %872 = vmatmul.f32.gmra.mxu3 %v3209_v20  ;;  %1676 = vmatpush.msra.mxu0 %v2395_v30  ;;  %v2378_v30 = vld [vmem:[%s4011_s1 + $0x2a8] sm:$0xff] }
  0xdf   : > { %v3288_v61 = vpop.f32.mrf.mxu2  ;;  %v3290_v32 = vpop.f32.mrf.mxu0  ;;  %1515 = vmatpush.msra.mxu3 %v2378_v30 }
  0xe1   : > { %v3295_v52 = vpop.f32.mrf.mxu1  ;;  %v3297_v24 = vpop.f32.mrf.mxu3 }
  0xe2   : > { %4024 = vst [vmem:[#allocation12_spill] sm:$0xff] %v3297_v24  ;;  %1034 = vmatmul.f32.gmra.mxu0 %v3293_v12 }
  0xe4   : > { %543 = vmatmul.f32.gmra.mxu1 %v2838_v46  ;;  %673 = vmatmul.f32.gmra.mxu2 %v2841_v47  ;;  %v2347_v46 = vld [vmem:[%s4011_s1 + $0x3b0] sm:$0xff] }
  0xe5   : > { %1150 = vmatpush.msra.mxu1 %v2347_v46 }
  0xe6   : > { %875 = vmatmul.f32.gmra.mxu3 %v3230_v28 }
  0xe7   : > { %v3309_v35 = vpop.f32.mrf.mxu2  ;;  %v3311_v6 = vpop.f32.mrf.mxu0  ;;  %1151 = vmatpush.msra.mxu1 %v2346_v11  ;;  %v3367_v11 = vld [vmem:[%s2735_s5 + $0xfa] sm:$0xff] }
  0xe9   : > { %v3319_v16 = vpop.f32.mrf.mxu1  ;;  %v3321_v10 = vpop.f32.mrf.mxu3 }
  0xea   : > { %4025 = vst [vmem:[#allocation13_spill] sm:$0xff] %v3321_v10  ;;  %1037 = vmatmul.f32.gmra.mxu0 %v3314_v48 }
  0xec   : > { %546 = vmatmul.f32.gmra.mxu1 %v2890_v62  ;;  %676 = vmatmul.f32.gmra.mxu2 %v2893_v63  ;;  %v2362_v62 = vld [vmem:[%s4011_s1 + $0x128] sm:$0xff] }
  0xed   : > { %1353 = vmatpush.msra.mxu2 %v2362_v62 }
  0xee   : > { %878 = vmatmul.f32.gmra.mxu3 %v3251_v40 }
  0xef   : > { %v3330_v0 = vpop.f32.mrf.mxu2  ;;  %v3332_v24 = vpop.f32.mrf.mxu0 }
  0xf0   : > { %4026 = vst [vmem:[#allocation14_spill] sm:$0xff] %v3330_v0 }
  0xf1   : > { %v3337_v46 = vpop.f32.mrf.mxu3  ;;  %v502_v10 = vpop.f32.mrf.mxu1 }
  0xf2   : > { %4027 = vst [vmem:[#allocation15_spill] sm:$0xff] %v3337_v46  ;;  %1040 = vmatmul.f32.gmra.mxu0 %v3335_v58  ;;  %v503_v44 = vadd.f32 %v502_v10, %v3185_v7 }
  0xf4   : > { %549 = vmatmul.f32.gmra.mxu1 %v2942_v14  ;;  %679 = vmatmul.f32.gmra.mxu2 %v2945_v15 }
  0xf6   : > { %881 = vmatmul.f32.gmra.mxu3 %v3272_v51 }
  0xf7   : > { %v632_v46 = vpop.f32.mrf.mxu2  ;;  %v996_v33 = vpop.f32.mrf.mxu0 }
  0xf8   : > { %v728_v14 = vadd.f32 %v632_v46, %v503_v44  ;;  %v2394_v44 = vld [vmem:[%s4011_s1 + $0x428] sm:$0xff] }
  0xf9   : > { %v505_v62 = vpop.f32.mrf.mxu1  ;;  %v834_v0 = vpop.f32.mrf.mxu3  ;;  %1677 = vmatpush.msra.mxu0 %v2394_v44 }
  0xfa   : > { %v930_v7 = vadd.f32 %v834_v0, %v728_v14  ;;  %1043 = vmatmul.f32.gmra.mxu0 %v3351_v23  ;;  %v506_v30 = vadd.f32 %v505_v62, %v3206_v18  ;;  %v2361_v18 = vld [vmem:[%s4011_s1 + $0x120] sm:$0xff] }
  0xfb   : > { %1354 = vmatpush.msra.mxu2 %v2361_v18 }
  0xfc   : > { %v3357_v10 = vadd.f32 %v996_v33, %v930_v7  ;;  %552 = vmatmul.f32.gmra.mxu1 %v2994_v37  ;;  %682 = vmatmul.f32.gmra.mxu2 %v2997_v38 }
  0xfe   : > { %884 = vmatmul.f32.gmra.mxu3 %v3293_v12 }
  0xff   : > { %v635_v46 = vpop.f32.mrf.mxu2  ;;  %v999_v51 = vpop.f32.mrf.mxu0 }
 0x100   : > { %v729_v33 = vadd.f32 %v635_v46, %v506_v30  ;;  %v2377_v30 = vld [vmem:[%s4011_s1 + $0x2a0] sm:$0xff]  ;;  %v3383_v46 = vld [vmem:[%s2735_s5 + $0x10a] sm:$0xff] }
 0x101   : > { %v508_v0 = vpop.f32.mrf.mxu1  ;;  %v837_v14 = vpop.f32.mrf.mxu3  ;;  %1516 = vmatpush.msra.mxu3 %v2377_v30 }
 0x102   : > { %v931_v37 = vadd.f32 %v837_v14, %v729_v33  ;;  %1046 = vmatmul.f32.gmra.mxu0 %v3367_v11  ;;  %v509_v62 = vadd.f32 %v508_v0, %v3227_v27  ;;  %v2345_v33 = vld [vmem:[%s4011_s1 + $0x3a0] sm:$0xff] }
 0x103   : > { %1152 = vmatpush.msra.mxu1 %v2345_v33  ;;  %v3399_v33 = vld [vmem:[%s2735_s5 + $0x112] sm:$0xff] }
 0x104   : > { %v3370_v7 = vadd.f32 %v999_v51, %v931_v37  ;;  %555 = vmatmul.f32.gmra.mxu1 %v3037_v54  ;;  %685 = vmatmul.f32.gmra.mxu2 %v3040_v55 }
 0x106   : > { %887 = vmatmul.f32.gmra.mxu3 %v3314_v48 }
 0x107   : > { %v638_v44 = vpop.f32.mrf.mxu2  ;;  %v1002_v51 = vpop.f32.mrf.mxu0 }
 0x108   : > { %v730_v54 = vadd.f32 %v638_v44, %v509_v62  ;;  %v2393_v62 = vld [vmem:[%s4011_s1 + $0x420] sm:$0xff] }
 0x109   : > { %v511_v14 = vpop.f32.mrf.mxu1  ;;  %v840_v37 = vpop.f32.mrf.mxu3  ;;  %1678 = vmatpush.msra.mxu0 %v2393_v62 }
 0x10a   : > { %v932_v27 = vadd.f32 %v840_v37, %v730_v54  ;;  %1049 = vmatmul.f32.gmra.mxu0 %v3383_v46  ;;  %v512_v18 = vadd.f32 %v511_v14, %v3248_v39  ;;  %v2360_v39 = vld [vmem:[%s4011_s1 + $0x118] sm:$0xff] }
 0x10b   : > { %1355 = vmatpush.msra.mxu2 %v2360_v39  ;;  %v2392_v39 = vld [vmem:[%s4011_s1 + $0x418] sm:$0xff] }
 0x10c   : > { %v3389_v0 = vadd.f32 %v1002_v51, %v932_v27  ;;  %558 = vmatmul.f32.gmra.mxu1 %v3065_v1  ;;  %688 = vmatmul.f32.gmra.mxu2 %v3068_v3 }
 0x10d   : > { %1679 = vmatpush.msra.mxu0 %v2392_v39  ;;  %v3447_v39 = vld [vmem:[%s2735_s5 + $0x13a] sm:$0xff] }
 0x10e   : > { %890 = vmatmul.f32.gmra.mxu3 %v3335_v58 }
 0x10f   : > { %v641_v30 = vpop.f32.mrf.mxu2  ;;  %v1005_v44 = vpop.f32.mrf.mxu0 }
 0x110   : > { %v731_v51 = vadd.f32 %v641_v30, %v512_v18  ;;  %v2376_v18 = vld [vmem:[%s4011_s1 + $0x298] sm:$0xff] }
 0x111   : > { %v514_v54 = vpop.f32.mrf.mxu1  ;;  %v843_v37 = vpop.f32.mrf.mxu3  ;;  %1517 = vmatpush.msra.mxu3 %v2376_v18 }
 0x112   : > { %v933_v1 = vadd.f32 %v843_v37, %v731_v51  ;;  %1052 = vmatmul.f32.gmra.mxu0 %v3399_v33  ;;  %v515_v14 = vadd.f32 %v514_v54, %v3269_v42 }
 0x114   : > { %v3402_v27 = vadd.f32 %v1005_v44, %v933_v1  ;;  %561 = vmatmul.f32.gmra.mxu1 %v2744_v17  ;;  %691 = vmatmul.f32.gmra.mxu2 %v2750_v19  ;;  %v3415_v44 = vld [vmem:[%s2735_s5 + $0x122] sm:$0xff]  ;;  %v2344_v19 = vld [vmem:[%s4011_s1 + $0x398] sm:$0xff] }
 0x115   : > { %1153 = vmatpush.msra.mxu1 %v2344_v19 }
 0x116   : > { %893 = vmatmul.f32.gmra.mxu3 %v3351_v23 }
 0x117   : > { %v644_v62 = vpop.f32.mrf.mxu2  ;;  %v1008_v30 = vpop.f32.mrf.mxu0 }
 0x118   : > { %v732_v17 = vadd.f32 %v644_v62, %v515_v14  ;;  %v3431_v62 = vld [vmem:[%s2735_s5 + $0x12a] sm:$0xff] }
 0x119   : > { %v517_v51 = vpop.f32.mrf.mxu1  ;;  %v846_v37 = vpop.f32.mrf.mxu3 }
 0x11a   : > { %v934_v42 = vadd.f32 %v846_v37, %v732_v17  ;;  %1055 = vmatmul.f32.gmra.mxu0 %v3415_v44  ;;  %v518_v1 = vadd.f32 %v517_v51, %v3290_v32  ;;  %v2359_v32 = vld [vmem:[%s4011_s1 + $0x110] sm:$0xff] }
 0x11b   : > { %1356 = vmatpush.msra.mxu2 %v2359_v32  ;;  %v2375_v37 = vld [vmem:[%s4011_s1 + $0x290] sm:$0xff] }
 0x11c   : > { %v3421_v54 = vadd.f32 %v1008_v30, %v934_v42  ;;  %564 = vmatmul.f32.gmra.mxu1 %v2789_v31  ;;  %694 = vmatmul.f32.gmra.mxu2 %v2799_v34 }
 0x11d   : > { %1518 = vmatpush.msra.mxu3 %v2375_v37 }
 0x11e   : > { %896 = vmatmul.f32.gmra.mxu3 %v3367_v11 }
 0x11f   : > { %v647_v14 = vpop.f32.mrf.mxu2  ;;  %v1011_v18 = vpop.f32.mrf.mxu0 }
 0x120   : > { %v733_v30 = vadd.f32 %v647_v14, %v518_v1 }
 0x121   : > { %v520_v17 = vpop.f32.mrf.mxu1  ;;  %v849_v19 = vpop.f32.mrf.mxu3 }
 0x122   : > { %v935_v31 = vadd.f32 %v849_v19, %v733_v30  ;;  %1058 = vmatmul.f32.gmra.mxu0 %v3431_v62  ;;  %v521_v51 = vadd.f32 %v520_v17, %v3311_v6  ;;  %v2391_v19 = vld [vmem:[%s4011_s1 + $0x410] sm:$0xff] }
 0x123   : > { %1680 = vmatpush.msra.mxu0 %v2391_v19 }
 0x124   : > { %v3434_v34 = vadd.f32 %v1011_v18, %v935_v31  ;;  %567 = vmatmul.f32.gmra.mxu1 %v2841_v47  ;;  %697 = vmatmul.f32.gmra.mxu2 %v2851_v50  ;;  %v2343_v50 = vld [vmem:[%s4011_s1 + $0x390] sm:$0xff] }
 0x125   : > { %1154 = vmatpush.msra.mxu1 %v2343_v50  ;;  %v2374_v50 = vld [vmem:[%s4011_s1 + $0x288] sm:$0xff] }
 0x126   : > { %899 = vmatmul.f32.gmra.mxu3 %v3383_v46 }
 0x127   : > { %v650_v42 = vpop.f32.mrf.mxu2  ;;  %v1014_v1 = vpop.f32.mrf.mxu0  ;;  %1519 = vmatpush.msra.mxu3 %v2374_v50 }
 0x128   : > { %v734_v47 = vadd.f32 %v650_v42, %v521_v51  ;;  %v3463_v51 = vld [vmem:[%s2735_s5 + $0x142] sm:$0xff] }
 0x129   : > { %v523_v14 = vpop.f32.mrf.mxu1  ;;  %v852_v18 = vpop.f32.mrf.mxu3 }
 0x12a   : > { %v936_v6 = vadd.f32 %v852_v18, %v734_v47  ;;  %1061 = vmatmul.f32.gmra.mxu0 %v3447_v39  ;;  %v524_v17 = vadd.f32 %v523_v14, %v3332_v24  ;;  %v2358_v24 = vld [vmem:[%s4011_s1 + $0x108] sm:$0xff] }
 0x12b   : > { %1357 = vmatpush.msra.mxu2 %v2358_v24 }
 0x12c   : > { %v3453_v30 = vadd.f32 %v1014_v1, %v936_v6  ;;  %570 = vmatmul.f32.gmra.mxu1 %v2893_v63  ;;  %700 = vmatmul.f32.gmra.mxu2 %v2903_v2  ;;  %v3479_v6 = vld [vmem:[%s2735_s5 + $0x152] sm:$0xff] }
 0x12e   : > { %902 = vmatmul.f32.gmra.mxu3 %v3399_v33 }
 0x12f   : > { %v653_v31 = vpop.f32.mrf.mxu2  ;;  %v1017_v32 = vpop.f32.mrf.mxu0 }
 0x130   : > { %v735_v37 = vadd.f32 %v653_v31, %v524_v17 }
 0x131   : > { %v526_v42 = vpop.f32.mrf.mxu1  ;;  %v855_v1 = vpop.f32.mrf.mxu3 }
 0x132   : > { %v937_v63 = vadd.f32 %v855_v1, %v735_v37  ;;  %1064 = vmatmul.f32.gmra.mxu0 %v3463_v51  ;;  %v527_v47 = vadd.f32 %v526_v42, %v3171_v60  ;;  %v2390_v37 = vld [vmem:[%s4011_s1 + $0x408] sm:$0xff] }
 0x133   : > { %1681 = vmatpush.msra.mxu0 %v2390_v37 }
 0x134   : > { %v3466_v2 = vadd.f32 %v1017_v32, %v937_v63  ;;  %573 = vmatmul.f32.gmra.mxu1 %v2945_v15  ;;  %703 = vmatmul.f32.gmra.mxu2 %v2955_v21  ;;  %v2342_v21 = vld [vmem:[%s4011_s1 + $0x388] sm:$0xff]  ;;  %v3495_v63 = vld [vmem:[%s2735_s5 + $0x15a] sm:$0xff] }
 0x135   : > { %1155 = vmatpush.msra.mxu1 %v2342_v21 }
 0x136   : > { %905 = vmatmul.f32.gmra.mxu3 %v3415_v44 }
 0x137   : > { %v656_v14 = vpop.f32.mrf.mxu2  ;;  %v1020_v18 = vpop.f32.mrf.mxu0 }
 0x138   : > { %v736_v15 = vadd.f32 %v656_v14, %v527_v47 }
 0x139   : > { %v529_v17 = vpop.f32.mrf.mxu1  ;;  %v858_v19 = vpop.f32.mrf.mxu3 }
 0x13a   : > { %v938_v60 = vadd.f32 %v858_v19, %v736_v15  ;;  %1067 = vmatmul.f32.gmra.mxu0 %v3479_v6  ;;  %v530_v32 = vadd.f32 %v529_v17, %v3193_v9  ;;  %v2357_v9 = vld [vmem:[%s4011_s1 + $0x100] sm:$0xff]  ;;  %v3511_v17 = vld [vmem:[%s2735_s5 + $0x16a] sm:$0xff] }
 0x13b   : > { %1358 = vmatpush.msra.mxu2 %v2357_v9  ;;  %v335_v9 = vld [vmem:[%s2735_s5 + $0x1b0] sm:$0xff] }
 0x13c   : > { %v3485_v31 = vadd.f32 %v1020_v18, %v938_v60  ;;  %576 = vmatmul.f32.gmra.mxu1 %v2997_v38  ;;  %706 = vmatmul.f32.gmra.mxu2 %v3007_v41  ;;  %v2373_v18 = vld [vmem:[%s4011_s1 + $0x280] sm:$0xff] }
 0x13d   : > { %1520 = vmatpush.msra.mxu3 %v2373_v18 }
 0x13e   : > { %908 = vmatmul.f32.gmra.mxu3 %v3431_v62 }
 0x13f   : > { %v659_v42 = vpop.f32.mrf.mxu2  ;;  %v1023_v1 = vpop.f32.mrf.mxu0 }
 0x140   : > { %v737_v24 = vadd.f32 %v659_v42, %v530_v32  ;;  %v2389_v42 = vld [vmem:[%s4011_s1 + $0x400] sm:$0xff] }
 0x141   : > { %v532_v47 = vpop.f32.mrf.mxu1  ;;  %v861_v50 = vpop.f32.mrf.mxu3  ;;  %1682 = vmatpush.msra.mxu0 %v2389_v42 }
 0x142   : > { %v939_v38 = vadd.f32 %v861_v50, %v737_v24  ;;  %1070 = vmatmul.f32.gmra.mxu0 %v3495_v63  ;;  %v533_v14 = vadd.f32 %v532_v47, %v3211_v22  ;;  %v3527_v47 = vld [vmem:[%s2735_s5 + $0x172] sm:$0xff] }
 0x144   : > { %v3498_v41 = vadd.f32 %v1023_v1, %v939_v38  ;;  %579 = vmatmul.f32.gmra.mxu1 %v3040_v55  ;;  %709 = vmatmul.f32.gmra.mxu2 %v3047_v57  ;;  %v2341_v57 = vld [vmem:[%s4011_s1 + $0x380] sm:$0xff] }
 0x145   : > { %1156 = vmatpush.msra.mxu1 %v2341_v57 }
 0x146   : > { %911 = vmatmul.f32.gmra.mxu3 %v3447_v39 }
 0x147   : > { %v662_v15 = vpop.f32.mrf.mxu2  ;;  %v1026_v21 = vpop.f32.mrf.mxu0 }
 0x148   : > { %v738_v55 = vadd.f32 %v662_v15, %v533_v14  ;;  %v2519_v14 = vld [vmem:[%s2735_s5 + $0x150] sm:$0xff] }
 0x149   : > { %v535_v19 = vpop.f32.mrf.mxu1  ;;  %v864_v60 = vpop.f32.mrf.mxu3 }
 0x14a   : > { %v940_v22 = vadd.f32 %v864_v60, %v738_v55  ;;  %1073 = vmatmul.f32.gmra.mxu0 %v3511_v17  ;;  %v536_v37 = vadd.f32 %v535_v19, %v3235_v29  ;;  %v3537_v55 = vld [vmem:[%s2735_s5 + $0x182] sm:$0xff] }
 0x14c   : > { %v3517_v32 = vadd.f32 %v1026_v21, %v940_v22  ;;  %582 = vmatmul.f32.gmra.mxu1 %v3068_v3  ;;  %712 = vmatmul.f32.gmra.mxu2 %v3072_v4  ;;  %v336_v22 = vld [vmem:[%s2735_s5 + $0x1b8] sm:$0xff] }
 0x14e   : > { %914 = vmatmul.f32.gmra.mxu3 %v3463_v51 }
 0x14f   : > { %v665_v1 = vpop.f32.mrf.mxu2  ;;  %v1029_v24 = vpop.f32.mrf.mxu0 }
 0x150   : > { %v739_v50 = vadd.f32 %v665_v1, %v536_v37  ;;  %v2520_v1 = vld [vmem:[%s2735_s5 + $0x158] sm:$0xff] }
 0x151   : > { %v538_v38 = vpop.f32.mrf.mxu1  ;;  %v867_v3 = vpop.f32.mrf.mxu3 }
 0x152   : > { %v941_v4 = vadd.f32 %v867_v3, %v739_v50  ;;  %1076 = vmatmul.f32.gmra.mxu0 %v3527_v47  ;;  %v539_v18 = vadd.f32 %v538_v38, %v3253_v43  ;;  %v3547_v38 = vld [vmem:[%s2735_s5 + $0x18a] sm:$0xff] }
 0x154   : > { %v3531_v29 = vadd.f32 %v1029_v24, %v941_v4  ;;  %585 = vmatmul.f32.gmra.mxu1 %v2519_v14  ;;  %715 = vmatmul.f32.gmra.mxu2 %v335_v9  ;;  %v337_v14 = vld [vmem:[%s2735_s5 + $0x1c8] sm:$0xff] }
 0x156   : > { %917 = vmatmul.f32.gmra.mxu3 %v3479_v6 }
 0x157   : > { %v668_v15 = vpop.f32.mrf.mxu2  ;;  %v1032_v21 = vpop.f32.mrf.mxu0 }
 0x158   : > { %v740_v57 = vadd.f32 %v668_v15, %v539_v18 }
 0x159   : > { %v541_v19 = vpop.f32.mrf.mxu1  ;;  %v870_v60 = vpop.f32.mrf.mxu3 }
 0x15a   : > { %v942_v37 = vadd.f32 %v870_v60, %v740_v57  ;;  %1079 = vmatmul.f32.gmra.mxu0 %v3537_v55  ;;  %v542_v43 = vadd.f32 %v541_v19, %v3277_v56  ;;  %v3557_v60 = vld [vmem:[%s2735_s5 + $0x19a] sm:$0xff] }
 0x15c   : > { %v3541_v42 = vadd.f32 %v1032_v21, %v942_v37  ;;  %588 = vmatmul.f32.gmra.mxu1 %v2520_v1  ;;  %718 = vmatmul.f32.gmra.mxu2 %v336_v22  ;;  %v2521_v21 = vld [vmem:[%s2735_s5 + $0x168] sm:$0xff] }
 0x15e   : > { %920 = vmatmul.f32.gmra.mxu3 %v3495_v63 }
 0x15f   : > { %v671_v24 = vpop.f32.mrf.mxu2  ;;  %v1035_v50 = vpop.f32.mrf.mxu0 }
 0x160   : > { %v741_v3 = vadd.f32 %v671_v24, %v542_v43  ;;  %v338_v43 = vld [vmem:[%s2735_s5 + $0x1d0] sm:$0xff] }
 0x161   : > { %v544_v9 = vpop.f32.mrf.mxu1  ;;  %v873_v4 = vpop.f32.mrf.mxu3 }
 0x162   : > { %v943_v18 = vadd.f32 %v873_v4, %v741_v3  ;;  %1082 = vmatmul.f32.gmra.mxu0 %v3547_v38  ;;  %v545_v56 = vadd.f32 %v544_v9, %v3295_v52  ;;  %v2522_v3 = vld [vmem:[%s2735_s5 + $0x170] sm:$0xff] }
 0x164   : > { %v3551_v15 = vadd.f32 %v1035_v50, %v943_v18  ;;  %591 = vmatmul.f32.gmra.mxu1 %v2521_v21  ;;  %721 = vmatmul.f32.gmra.mxu2 %v337_v14  ;;  %v3567_v14 = vld [vmem:[%s2735_s5 + $0x1a2] sm:$0xff] }
 0x166   : > { %923 = vmatmul.f32.gmra.mxu3 %v3511_v17 }
 0x167   : > { %v674_v57 = vpop.f32.mrf.mxu2  ;;  %v1038_v19 = vpop.f32.mrf.mxu0 }
 0x168   : > { %v742_v22 = vadd.f32 %v674_v57, %v545_v56  ;;  %v1286_v57 = vld [vmem:[%s2735_s5 + $0x4] sm:$0xff] }
 0x169   : > { %v547_v37 = vpop.f32.mrf.mxu1  ;;  %v876_v1 = vpop.f32.mrf.mxu3 }
 0x16a   : > { %v944_v24 = vadd.f32 %v876_v1, %v742_v22  ;;  %1085 = vmatmul.f32.gmra.mxu0 %v3557_v60  ;;  %v548_v52 = vadd.f32 %v547_v37, %v3319_v16 }
 0x16c   : > { %v3561_v50 = vadd.f32 %v1038_v19, %v944_v24  ;;  %594 = vmatmul.f32.gmra.mxu1 %v2522_v3  ;;  %724 = vmatmul.f32.gmra.mxu2 %v338_v43  ;;  %v1290_v19 = vld [vmem:[%s2735_s5 + $0x34] sm:$0xff]  ;;  %v3577_v24 = vld [vmem:[%s2735_s5 + $0x64] sm:$0xff] }
 0x16e   : > { %926 = vmatmul.f32.gmra.mxu3 %v3527_v47 }
 0x16f   : > { %v677_v9 = vpop.f32.mrf.mxu2  ;;  %v1041_v4 = vpop.f32.mrf.mxu0 }
 0x170   : > { %v743_v18 = vadd.f32 %v677_v9, %v548_v52 }
 0x171   : > { %v550_v21 = vpop.f32.mrf.mxu1  ;;  %v879_v56 = vpop.f32.mrf.mxu3 }
 0x172   : > { %v945_v22 = vadd.f32 %v879_v56, %v743_v18  ;;  %1088 = vmatmul.f32.gmra.mxu0 %v3567_v14  ;;  %v551_v16 = vadd.f32 %v550_v21, %v3183_v5  ;;  %v1287_v18 = vld [vmem:[%s2735_s5 + $0xc] sm:$0xff] }
 0x174   : > { %v3572_v1 = vadd.f32 %v1041_v4, %v945_v22  ;;  %1157 = vmatmul.f32.vlgmr.msra.gmra.mxu1 %v3133_v45  ;;  %1359 = vmatmul.f32.vlgmr.msra.gmra.mxu2 %v1286_v57  ;;  %v1291_v4 = vld [vmem:[%s2735_s5 + $0x3c] sm:$0xff]  ;;  %v3587_v22 = vld [vmem:[%s2735_s5 + $0x6c] sm:$0xff] }
 0x176   : > { %4028 = vst [vmem:[#allocation16_spill] sm:$0xff] %v3572_v1  ;;  %1521 = vmatmul.f32.vlgmr.msra.gmra.mxu3 %v1290_v19 }
 0x177   : > { %v680_v37 = vpop.f32.mrf.mxu2  ;;  %v1044_v43 = vpop.f32.mrf.mxu0 }
 0x178   : > { %v744_v3 = vadd.f32 %v680_v37, %v551_v16 }
 0x179   : > { %v553_v52 = vpop.f32.mrf.mxu1  ;;  %v882_v9 = vpop.f32.mrf.mxu3 }
 0x17a   : > { %v946_v56 = vadd.f32 %v882_v9, %v744_v3  ;;  %1683 = vmatmul.f32.vlgmr.msra.gmra.mxu0 %v3577_v24  ;;  %v554_v5 = vadd.f32 %v553_v52, %v3204_v13  ;;  %v1288_v9 = vld [vmem:[%s2735_s5 + $0x1c] sm:$0xff] }
 0x17c   : > { %v3582_v45 = vadd.f32 %v1044_v43, %v946_v56  ;;  %1160 = vmatmul.f32.gmra.mxu1 %v3145_v49  ;;  %1362 = vmatmul.f32.gmra.mxu2 %v1287_v18  ;;  %v1292_v43 = vld [vmem:[%s2735_s5 + $0x4c] sm:$0xff]  ;;  %v3597_v56 = vld [vmem:[%s2735_s5 + $0x7c] sm:$0xff] }
 0x17e   : > { %4029 = vst [vmem:[#allocation17_spill] sm:$0xff] %v3582_v45  ;;  %1524 = vmatmul.f32.gmra.mxu3 %v1291_v4 }
 0x17f   : > { %v683_v21 = vpop.f32.mrf.mxu2  ;;  %v1047_v57 = vpop.f32.mrf.mxu0 }
 0x180   : > { %v745_v16 = vadd.f32 %v683_v21, %v554_v5 }
 0x181   : > { %v556_v37 = vpop.f32.mrf.mxu1  ;;  %v885_v3 = vpop.f32.mrf.mxu3 }
 0x182   : > { %v947_v1 = vadd.f32 %v885_v3, %v745_v16  ;;  %1686 = vmatmul.f32.gmra.mxu0 %v3587_v22  ;;  %v557_v13 = vadd.f32 %v556_v37, %v3225_v25  ;;  %v1289_v3 = vld [vmem:[%s2735_s5 + $0x24] sm:$0xff] }
 0x184   : > { %v3592_v49 = vadd.f32 %v1047_v57, %v947_v1  ;;  %1163 = vmatmul.f32.gmra.mxu1 %v3157_v53  ;;  %1365 = vmatmul.f32.gmra.mxu2 %v1288_v9  ;;  %v1293_v1 = vld [vmem:[%s2735_s5 + $0x54] sm:$0xff]  ;;  %v3607_v9 = vld [vmem:[%s2735_s5 + $0x84] sm:$0xff] }
 0x186   : > { %4030 = vst [vmem:[#allocation18_spill] sm:$0xff] %v3592_v49  ;;  %1527 = vmatmul.f32.gmra.mxu3 %v1292_v43 }
 0x187   : > { %v686_v52 = vpop.f32.mrf.mxu2  ;;  %v1050_v18 = vpop.f32.mrf.mxu0 }
 0x188   : > { %v746_v5 = vadd.f32 %v686_v52, %v557_v13 }
 0x189   : > { %v559_v21 = vpop.f32.mrf.mxu1  ;;  %v888_v16 = vpop.f32.mrf.mxu3 }
 0x18a   : > { %v948_v45 = vadd.f32 %v888_v16, %v746_v5  ;;  %1689 = vmatmul.f32.gmra.mxu0 %v3597_v56  ;;  %v560_v53 = vadd.f32 %v559_v21, %v3246_v36 }
 0x18c   : > { %v3602_v57 = vadd.f32 %v1050_v18, %v948_v45  ;;  %1166 = vmatmul.f32.gmra.mxu1 %v3169_v59  ;;  %1368 = vmatmul.f32.gmra.mxu2 %v1289_v3  ;;  %v3616_v18 = vld [vmem:[%s2735_s5 + $0x94] sm:$0xff] }
 0x18e   : > { %1530 = vmatmul.f32.gmra.mxu3 %v1293_v1 }
 0x18f   : > { %v689_v25 = vpop.f32.mrf.mxu2  ;;  %v1053_v37 = vpop.f32.mrf.mxu0 }
 0x190   : > { %v747_v13 = vadd.f32 %v689_v25, %v560_v53 }
 0x191   : > { %v562_v52 = vpop.f32.mrf.mxu1  ;;  %v891_v49 = vpop.f32.mrf.mxu3 }
 0x192   : > { %v949_v5 = vadd.f32 %v891_v49, %v747_v13  ;;  %1692 = vmatmul.f32.gmra.mxu0 %v3607_v9  ;;  %v563_v59 = vadd.f32 %v562_v52, %v3267_v26 }
 0x194   : > { %v3610_v16 = vadd.f32 %v1053_v37, %v949_v5  ;;  %1169 = vmatmul.f32.gmra.mxu1 %v3188_v8  ;;  %1371 = vmatmul.f32.gmra.mxu2 %v1290_v19  ;;  %v3625_v37 = vld [vmem:[%s2735_s5 + $0x9c] sm:$0xff] }
 0x196   : > { %1533 = vmatmul.f32.gmra.mxu3 %v3577_v24 }
 0x197   : > { %v692_v36 = vpop.f32.mrf.mxu2  ;;  %v1056_v45 = vpop.f32.mrf.mxu0 }
 0x198   : > { %v748_v21 = vadd.f32 %v692_v36, %v563_v59 }
 0x199   : > { %v565_v3 = vpop.f32.mrf.mxu1  ;;  %v894_v53 = vpop.f32.mrf.mxu3 }
 0x19a   : > { %v950_v49 = vadd.f32 %v894_v53, %v748_v21  ;;  %1695 = vmatmul.f32.gmra.mxu0 %v3616_v18  ;;  %v566_v8 = vadd.f32 %v565_v3, %v3288_v61 }
 0x19c   : > { %v3619_v25 = vadd.f32 %v1056_v45, %v950_v49  ;;  %1172 = vmatmul.f32.gmra.mxu1 %v3209_v20  ;;  %1374 = vmatmul.f32.gmra.mxu2 %v1291_v4  ;;  %v3634_v45 = vld [vmem:[%s2735_s5 + $0xac] sm:$0xff] }
 0x19e   : > { %1536 = vmatmul.f32.gmra.mxu3 %v3587_v22 }
 0x19f   : > { %v695_v26 = vpop.f32.mrf.mxu2  ;;  %v1059_v19 = vpop.f32.mrf.mxu0 }
 0x1a0   : > { %v749_v13 = vadd.f32 %v695_v26, %v566_v8 }
 0x1a1   : > { %v568_v52 = vpop.f32.mrf.mxu1  ;;  %v897_v5 = vpop.f32.mrf.mxu3 }
 0x1a2   : > { %v951_v59 = vadd.f32 %v897_v5, %v749_v13  ;;  %1698 = vmatmul.f32.gmra.mxu0 %v3625_v37  ;;  %v569_v20 = vadd.f32 %v568_v52, %v3309_v35 }
 0x1a4   : > { %v3628_v36 = vadd.f32 %v1059_v19, %v951_v59  ;;  %1175 = vmatmul.f32.gmra.mxu1 %v3230_v28  ;;  %1377 = vmatmul.f32.gmra.mxu2 %v1292_v43  ;;  %v4031_v28 = vld [vmem:[#allocation14_spill] sm:$0xff]  ;;  %v3643_v19 = vld [vmem:[%s2735_s5 + $0xb4] sm:$0xff] }
 0x1a6   : > { %1539 = vmatmul.f32.gmra.mxu3 %v3597_v56 }
 0x1a7   : > { %v698_v61 = vpop.f32.mrf.mxu2  ;;  %v1062_v4 = vpop.f32.mrf.mxu0 }
 0x1a8   : > { %v750_v21 = vadd.f32 %v698_v61, %v569_v20  ;;  %v4032_v61 = vld [vmem:[#allocation10_spill] sm:$0xff] }
 0x1a9   : > { %v571_v3 = vpop.f32.mrf.mxu1  ;;  %v900_v53 = vpop.f32.mrf.mxu3 }
 0x1aa   : > { %v952_v49 = vadd.f32 %v900_v53, %v750_v21  ;;  %1701 = vmatmul.f32.gmra.mxu0 %v3634_v45  ;;  %v572_v35 = vadd.f32 %v571_v3, %v4031_v28  ;;  %v3653_v3 = vld [vmem:[%s2735_s5 + $0xc4] sm:$0xff] }
 0x1ac   : > { %v3637_v8 = vadd.f32 %v1062_v4, %v952_v49  ;;  %1178 = vmatmul.f32.gmra.mxu1 %v3251_v40  ;;  %1380 = vmatmul.f32.gmra.mxu2 %v1293_v1  ;;  %v4033_v40 = vld [vmem:[#allocation6_spill] sm:$0xff] }
 0x1ae   : > { %1542 = vmatmul.f32.gmra.mxu3 %v3607_v9 }
 0x1af   : > { %v701_v43 = vpop.f32.mrf.mxu2  ;;  %v1065_v26 = vpop.f32.mrf.mxu0 }
 0x1b0   : > { %v751_v13 = vadd.f32 %v701_v43, %v572_v35 }
 0x1b1   : > { %v574_v52 = vpop.f32.mrf.mxu1  ;;  %v903_v5 = vpop.f32.mrf.mxu3 }
 0x1b2   : > { %v953_v59 = vadd.f32 %v903_v5, %v751_v13  ;;  %1704 = vmatmul.f32.gmra.mxu0 %v3643_v19  ;;  %v575_v1 = vadd.f32 %v574_v52, %v4033_v40  ;;  %v3663_v5 = vld [vmem:[%s2735_s5 + $0xcc] sm:$0xff] }
 0x1b4   : > { %v3646_v20 = vadd.f32 %v1065_v26, %v953_v59  ;;  %1181 = vmatmul.f32.gmra.mxu1 %v4032_v61  ;;  %1383 = vmatmul.f32.gmra.mxu2 %v3577_v24  ;;  %v4034_v24 = vld [vmem:[#allocation7_spill] sm:$0xff] }
 0x1b6   : > { %1545 = vmatmul.f32.gmra.mxu3 %v3616_v18 }
 0x1b7   : > { %v704_v4 = vpop.f32.mrf.mxu2  ;;  %v1068_v21 = vpop.f32.mrf.mxu0 }
 0x1b8   : > { %v752_v53 = vadd.f32 %v704_v4, %v575_v1 }
 0x1b9   : > { %v577_v49 = vpop.f32.mrf.mxu1  ;;  %v906_v28 = vpop.f32.mrf.mxu3 }
 0x1ba   : > { %v954_v35 = vadd.f32 %v906_v28, %v752_v53  ;;  %1707 = vmatmul.f32.gmra.mxu0 %v3653_v3  ;;  %v578_v26 = vadd.f32 %v577_v49, %v4034_v24  ;;  %v3673_v49 = vld [vmem:[%s2735_s5 + $0xdc] sm:$0xff] }
 0x1bc   : > { %v3656_v43 = vadd.f32 %v1068_v21, %v954_v35  ;;  %1184 = vmatmul.f32.gmra.mxu1 %v3293_v12  ;;  %1386 = vmatmul.f32.gmra.mxu2 %v3587_v22  ;;  %v4035_v12 = vld [vmem:[#allocation8_spill] sm:$0xff] }
 0x1be   : > { %1548 = vmatmul.f32.gmra.mxu3 %v3625_v37 }
 0x1bf   : > { %v707_v13 = vpop.f32.mrf.mxu2  ;;  %v1071_v52 = vpop.f32.mrf.mxu0 }
 0x1c0   : > { %v753_v59 = vadd.f32 %v707_v13, %v578_v26 }
 0x1c1   : > { %v580_v61 = vpop.f32.mrf.mxu1  ;;  %v909_v40 = vpop.f32.mrf.mxu3 }
 0x1c2   : > { %v955_v1 = vadd.f32 %v909_v40, %v753_v59  ;;  %1710 = vmatmul.f32.gmra.mxu0 %v3663_v5  ;;  %v581_v22 = vadd.f32 %v580_v61, %v4035_v12  ;;  %v3683_v61 = vld [vmem:[%s2735_s5 + $0xe4] sm:$0xff] }
 0x1c4   : > { %v3666_v4 = vadd.f32 %v1071_v52, %v955_v1  ;;  %1187 = vmatmul.f32.gmra.mxu1 %v3314_v48  ;;  %1389 = vmatmul.f32.gmra.mxu2 %v3597_v56  ;;  %v4036_v48 = vld [vmem:[#allocation9_spill] sm:$0xff] }
 0x1c6   : > { %1551 = vmatmul.f32.gmra.mxu3 %v3634_v45 }
 0x1c7   : > { %v710_v21 = vpop.f32.mrf.mxu2  ;;  %v1074_v53 = vpop.f32.mrf.mxu0 }
 0x1c8   : > { %v754_v28 = vadd.f32 %v710_v21, %v581_v22 }
 0x1c9   : > { %v583_v35 = vpop.f32.mrf.mxu1  ;;  %v912_v24 = vpop.f32.mrf.mxu3 }
 0x1ca   : > { %v956_v26 = vadd.f32 %v912_v24, %v754_v28  ;;  %1713 = vmatmul.f32.gmra.mxu0 %v3673_v49  ;;  %v584_v56 = vadd.f32 %v583_v35, %v4036_v48  ;;  %v3693_v35 = vld [vmem:[%s2735_s5 + $0xf4] sm:$0xff] }
 0x1cc   : > { %v3676_v13 = vadd.f32 %v1074_v53, %v956_v26  ;;  %1190 = vmatmul.f32.gmra.mxu1 %v3335_v58  ;;  %1392 = vmatmul.f32.gmra.mxu2 %v3607_v9  ;;  %v4037_v58 = vld [vmem:[#allocation11_spill] sm:$0xff] }
 0x1ce   : > { %1554 = vmatmul.f32.gmra.mxu3 %v3643_v19 }
 0x1cf   : > { %v713_v52 = vpop.f32.mrf.mxu2  ;;  %v1077_v59 = vpop.f32.mrf.mxu0 }
 0x1d0   : > { %v755_v40 = vadd.f32 %v713_v52, %v584_v56 }
 0x1d1   : > { %v586_v1 = vpop.f32.mrf.mxu1  ;;  %v915_v12 = vpop.f32.mrf.mxu3 }
 0x1d2   : > { %v957_v22 = vadd.f32 %v915_v12, %v755_v40  ;;  %1716 = vmatmul.f32.gmra.mxu0 %v3683_v61  ;;  %v587_v9 = vadd.f32 %v586_v1, %v4037_v58  ;;  %v3703_v1 = vld [vmem:[%s2735_s5 + $0xfc] sm:$0xff] }
 0x1d4   : > { %v3686_v21 = vadd.f32 %v1077_v59, %v957_v22  ;;  %1193 = vmatmul.f32.gmra.mxu1 %v3351_v23  ;;  %1395 = vmatmul.f32.gmra.mxu2 %v3616_v18  ;;  %v4038_v23 = vld [vmem:[#allocation12_spill] sm:$0xff] }
 0x1d6   : > { %1557 = vmatmul.f32.gmra.mxu3 %v3653_v3 }
 0x1d7   : > { %v716_v53 = vpop.f32.mrf.mxu2  ;;  %v1080_v28 = vpop.f32.mrf.mxu0 }
 0x1d8   : > { %v756_v24 = vadd.f32 %v716_v53, %v587_v9 }
 0x1d9   : > { %v589_v26 = vpop.f32.mrf.mxu1  ;;  %v918_v48 = vpop.f32.mrf.mxu3 }
 0x1da   : > { %v958_v56 = vadd.f32 %v918_v48, %v756_v24  ;;  %1719 = vmatmul.f32.gmra.mxu0 %v3693_v35  ;;  %v590_v18 = vadd.f32 %v589_v26, %v4038_v23  ;;  %v3713_v26 = vld [vmem:[%s2735_s5 + $0x10c] sm:$0xff] }
 0x1dc   : > { %v3696_v52 = vadd.f32 %v1080_v28, %v958_v56  ;;  %1196 = vmatmul.f32.gmra.mxu1 %v3367_v11  ;;  %1398 = vmatmul.f32.gmra.mxu2 %v3625_v37  ;;  %v4039_v11 = vld [vmem:[#allocation13_spill] sm:$0xff] }
 0x1de   : > { %1560 = vmatmul.f32.gmra.mxu3 %v3663_v5 }
 0x1df   : > { %v719_v59 = vpop.f32.mrf.mxu2  ;;  %v1083_v40 = vpop.f32.mrf.mxu0 }
 0x1e0   : > { %v757_v12 = vadd.f32 %v719_v59, %v590_v18 }
 0x1e1   : > { %v592_v22 = vpop.f32.mrf.mxu1  ;;  %v921_v58 = vpop.f32.mrf.mxu3 }
 0x1e2   : > { %v959_v9 = vadd.f32 %v921_v58, %v757_v12  ;;  %1722 = vmatmul.f32.gmra.mxu0 %v3703_v1  ;;  %v593_v37 = vadd.f32 %v592_v22, %v4039_v11  ;;  %v3723_v22 = vld [vmem:[%s2735_s5 + $0x114] sm:$0xff] }
 0x1e4   : > { %v3706_v53 = vadd.f32 %v1083_v40, %v959_v9  ;;  %1199 = vmatmul.f32.gmra.mxu1 %v3383_v46  ;;  %1401 = vmatmul.f32.gmra.mxu2 %v3634_v45  ;;  %v4040_v46 = vld [vmem:[#allocation15_spill] sm:$0xff] }
 0x1e6   : > { %1563 = vmatmul.f32.gmra.mxu3 %v3673_v49 }
 0x1e7   : > { %v722_v28 = vpop.f32.mrf.mxu2  ;;  %v1086_v24 = vpop.f32.mrf.mxu0 }
 0x1e8   : > { %v758_v48 = vadd.f32 %v722_v28, %v593_v37 }
 0x1e9   : > { %v595_v56 = vpop.f32.mrf.mxu1  ;;  %v924_v23 = vpop.f32.mrf.mxu3 }
 0x1ea   : > { %v960_v18 = vadd.f32 %v924_v23, %v758_v48  ;;  %1725 = vmatmul.f32.gmra.mxu0 %v3713_v26  ;;  %v596_v45 = vadd.f32 %v595_v56, %v4040_v46  ;;  %v3733_v48 = vld [vmem:[%s2735_s5 + $0x124] sm:$0xff] }
 0x1ec   : > { %v3716_v59 = vadd.f32 %v1086_v24, %v960_v18  ;;  %1202 = vmatmul.f32.gmra.mxu1 %v3399_v33  ;;  %1404 = vmatmul.f32.gmra.mxu2 %v3643_v19 }
 0x1ee   : > { %1566 = vmatmul.f32.gmra.mxu3 %v3683_v61 }
 0x1ef   : > { %v725_v40 = vpop.f32.mrf.mxu2  ;;  %v1089_v12 = vpop.f32.mrf.mxu0 }
 0x1f0   : > { %v759_v58 = vadd.f32 %v725_v40, %v596_v45 }
 0x1f1   : > { %v927_v9 = vpop.f32.mrf.mxu3  ;;  %v1158_v11 = vpop.f32.mrf.mxu1 }
 0x1f2   : > { %v961_v37 = vadd.f32 %v927_v9, %v759_v58  ;;  %1728 = vmatmul.f32.gmra.mxu0 %v3723_v22  ;;  %v1254_v33 = vadd.f32 %v1158_v11, %v3357_v10  ;;  %v3755_v9 = vld [vmem:[%s2735_s5 + $0x12c] sm:$0xff] }
 0x1f4   : > { %v3726_v28 = vadd.f32 %v1089_v12, %v961_v37  ;;  %1205 = vmatmul.f32.gmra.mxu1 %v3415_v44  ;;  %1407 = vmatmul.f32.gmra.mxu2 %v3653_v3  ;;  %v3738_v44 = vld [vmem:[%s4012_s2] ss:$0 sm:$0xff] }
 0x1f5   : > { %v3745_v3 = vld [vmem:[%s4013_s3] ss:$0 sm:$0xff] }
 0x1f6   : > { %1569 = vmatmul.f32.gmra.mxu3 %v3693_v35 }
 0x1f7   : > { %v1360_v19 = vpop.f32.mrf.mxu2  ;;  %v1684_v24 = vpop.f32.mrf.mxu0 }
 0x1f8   : > { %v1456_v56 = vadd.f32 %v1360_v19, %v1254_v33 }
 0x1f9   : > { %v1161_v23 = vpop.f32.mrf.mxu1  ;;  %v1522_v18 = vpop.f32.mrf.mxu3 }
 0x1fa   : > { %v1618_v46 = vadd.f32 %v1522_v18, %v1456_v56  ;;  %1731 = vmatmul.f32.gmra.mxu0 %v3733_v48  ;;  %v1255_v45 = vadd.f32 %v1161_v23, %v3370_v7 }
 0x1fc   : > { %v1780_v10 = vadd.f32 %v1684_v24, %v1618_v46  ;;  %1208 = vmatmul.f32.gmra.mxu1 %v3431_v62  ;;  %1410 = vmatmul.f32.gmra.mxu2 %v3663_v5  ;;  %v3768_v46 = vld [vmem:[%s2735_s5 + $0x13c] sm:$0xff] }
 0x1fe   : > { %v1987_v40 = vmul.f32 %v3738_v44, %v1780_v10  ;;  %1572 = vmatmul.f32.gmra.mxu3 %v3703_v1 }
 0x1ff   : > { %v1363_v12 = vpop.f32.mrf.mxu2  ;;  %v1687_v58 = vpop.f32.mrf.mxu0 }
 0x200   : > { %v2023_v11 = vadd.f32 %v3745_v3, %v1987_v40  ;;  %v1457_v37 = vadd.f32 %v1363_v12, %v1255_v45 }
 0x201   : > { %v1164_v33 = vpop.f32.mrf.mxu1  ;;  %v1525_v62 = vpop.f32.mrf.mxu3 }
 0x202   : > { %v2055_v19 = vmax.f32 %v2023_v11, 0.0  ;;  %v1619_v5 = vadd.f32 %v1525_v62, %v1457_v37  ;;  %1734 = vmatmul.f32.gmra.mxu0 %v3755_v9  ;;  %v1256_v24 = vadd.f32 %v1164_v33, %v3389_v0  ;;  %v3779_v62 = vld [vmem:[%s2735_s5 + $0x144] sm:$0xff] }
 0x204   : > { %2087 = vst [vmem:[%s3759_s21] sm:$0xff] %v2055_v19  ;;  %v1781_v7 = vadd.f32 %v1687_v58, %v1619_v5  ;;  %1211 = vmatmul.f32.gmra.mxu1 %v3447_v39  ;;  %1413 = vmatmul.f32.gmra.mxu2 %v3673_v49 }
 0x206   : > { %v1988_v56 = vmul.f32 %v3738_v44, %v1781_v7  ;;  %1575 = vmatmul.f32.gmra.mxu3 %v3713_v26 }
 0x207   : > { %v1366_v23 = vpop.f32.mrf.mxu2  ;;  %v1690_v18 = vpop.f32.mrf.mxu0 }
 0x208   : > { %v2024_v10 = vadd.f32 %v3745_v3, %v1988_v56  ;;  %v1458_v45 = vadd.f32 %v1366_v23, %v1256_v24 }
 0x209   : > { %v1167_v40 = vpop.f32.mrf.mxu1  ;;  %v1528_v12 = vpop.f32.mrf.mxu3 }
 0x20a   : > { %v2056_v58 = vmax.f32 %v2024_v10, 0.0  ;;  %v1620_v39 = vadd.f32 %v1528_v12, %v1458_v45  ;;  %1737 = vmatmul.f32.gmra.mxu0 %v3768_v46  ;;  %v1257_v49 = vadd.f32 %v1167_v40, %v3402_v27  ;;  %v3790_v45 = vld [vmem:[%s2735_s5 + $0x154] sm:$0xff] }
 0x20c   : > { %2088 = vst [vmem:[%s3759_s21 + $0x8] sm:$0xff] %v2056_v58  ;;  %v1782_v0 = vadd.f32 %v1690_v18, %v1620_v39  ;;  %1214 = vmatmul.f32.gmra.mxu1 %v3463_v51  ;;  %1416 = vmatmul.f32.gmra.mxu2 %v3683_v61 }
 0x20e   : > { %v1989_v11 = vmul.f32 %v3738_v44, %v1782_v0  ;;  %1578 = vmatmul.f32.gmra.mxu3 %v3723_v22 }
 0x20f   : > { %v1369_v37 = vpop.f32.mrf.mxu2  ;;  %v1693_v33 = vpop.f32.mrf.mxu0 }
 0x210   : > { %v2025_v19 = vadd.f32 %v3745_v3, %v1989_v11  ;;  %v1459_v5 = vadd.f32 %v1369_v37, %v1257_v49 }
 0x211   : > { %v1170_v7 = vpop.f32.mrf.mxu1  ;;  %v1531_v24 = vpop.f32.mrf.mxu3 }
 0x212   : > { %v2057_v56 = vmax.f32 %v2025_v19, 0.0  ;;  %v1621_v51 = vadd.f32 %v1531_v24, %v1459_v5  ;;  %1740 = vmatmul.f32.gmra.mxu0 %v3779_v62  ;;  %v1258_v61 = vadd.f32 %v1170_v7, %v3421_v54 }
 0x214   : > { %2089 = vst [vmem:[%s3759_s21 + $0x10] sm:$0xff] %v2057_v56  ;;  %v1783_v27 = vadd.f32 %v1693_v33, %v1621_v51  ;;  %1217 = vmatmul.f32.gmra.mxu1 %v3479_v6  ;;  %1419 = vmatmul.f32.gmra.mxu2 %v3693_v35  ;;  %v3801_v33 = vld [vmem:[%s2735_s5 + $0x15c] sm:$0xff] }
 0x216   : > { %v1990_v23 = vmul.f32 %v3738_v44, %v1783_v27  ;;  %1581 = vmatmul.f32.gmra.mxu3 %v3733_v48 }
 0x217   : > { %v1372_v18 = vpop.f32.mrf.mxu2  ;;  %v1696_v10 = vpop.f32.mrf.mxu0 }
 0x218   : > { %v2026_v40 = vadd.f32 %v3745_v3, %v1990_v23  ;;  %v1460_v12 = vadd.f32 %v1372_v18, %v1258_v61  ;;  %v3812_v23 = vld [vmem:[%s2735_s5 + $0x16c] sm:$0xff] }
 0x219   : > { %v1173_v58 = vpop.f32.mrf.mxu1  ;;  %v1534_v39 = vpop.f32.mrf.mxu3 }
 0x21a   : > { %v2058_v0 = vmax.f32 %v2026_v40, 0.0  ;;  %v1622_v6 = vadd.f32 %v1534_v39, %v1460_v12  ;;  %1743 = vmatmul.f32.gmra.mxu0 %v3790_v45  ;;  %v1259_v35 = vadd.f32 %v1173_v58, %v3434_v34 }
 0x21c   : > { %2090 = vst [vmem:[%s3759_s21 + $0x18] sm:$0xff] %v2058_v0  ;;  %v1784_v54 = vadd.f32 %v1696_v10, %v1622_v6  ;;  %1220 = vmatmul.f32.gmra.mxu1 %v3495_v63  ;;  %1422 = vmatmul.f32.gmra.mxu2 %v3703_v1 }
 0x21e   : > { %v1991_v49 = vmul.f32 %v3738_v44, %v1784_v54  ;;  %1584 = vmatmul.f32.gmra.mxu3 %v3755_v9  ;;  %v3823_v54 = vld [vmem:[%s2735_s5 + $0x174] sm:$0xff] }
 0x21f   : > { %v1375_v11 = vpop.f32.mrf.mxu2  ;;  %v1699_v37 = vpop.f32.mrf.mxu0 }
 0x220   : > { %v2027_v19 = vadd.f32 %v3745_v3, %v1991_v49  ;;  %v1461_v5 = vadd.f32 %v1375_v11, %v1259_v35 }
 0x221   : > { %v1176_v7 = vpop.f32.mrf.mxu1  ;;  %v1537_v24 = vpop.f32.mrf.mxu3 }
 0x222   : > { %v2059_v56 = vmax.f32 %v2027_v19, 0.0  ;;  %v1623_v63 = vadd.f32 %v1537_v24, %v1461_v5  ;;  %1746 = vmatmul.f32.gmra.mxu0 %v3801_v33  ;;  %v1260_v1 = vadd.f32 %v1176_v7, %v3453_v30 }
 0x224   : > { %2091 = vst [vmem:[%s3759_s21 + $0x20] sm:$0xff] %v2059_v56  ;;  %v1785_v34 = vadd.f32 %v1699_v37, %v1623_v63  ;;  %1223 = vmatmul.f32.gmra.mxu1 %v3511_v17  ;;  %1425 = vmatmul.f32.gmra.mxu2 %v3713_v26  ;;  %v3834_v56 = vld [vmem:[%s2735_s5 + $0x184] sm:$0xff] }
 0x226   : > { %v1992_v51 = vmul.f32 %v3738_v44, %v1785_v34  ;;  %1587 = vmatmul.f32.gmra.mxu3 %v3768_v46 }
 0x227   : > { %v1378_v27 = vpop.f32.mrf.mxu2  ;;  %v1702_v61 = vpop.f32.mrf.mxu0 }
 0x228   : > { %v2028_v18 = vadd.f32 %v3745_v3, %v1992_v51  ;;  %v1462_v10 = vadd.f32 %v1378_v27, %v1260_v1 }
 0x229   : > { %v1179_v40 = vpop.f32.mrf.mxu1  ;;  %v1540_v12 = vpop.f32.mrf.mxu3 }
 0x22a   : > { %v2060_v58 = vmax.f32 %v2028_v18, 0.0  ;;  %v1624_v17 = vadd.f32 %v1540_v12, %v1462_v10  ;;  %1749 = vmatmul.f32.gmra.mxu0 %v3812_v23  ;;  %v1261_v26 = vadd.f32 %v1179_v40, %v3466_v2  ;;  %v3845_v40 = vld [vmem:[%s2735_s5 + $0x18c] sm:$0xff] }
 0x22c   : > { %2092 = vst [vmem:[%s3759_s21 + $0x28] sm:$0xff] %v2060_v58  ;;  %v1786_v30 = vadd.f32 %v1702_v61, %v1624_v17  ;;  %1226 = vmatmul.f32.gmra.mxu1 %v3527_v47  ;;  %1428 = vmatmul.f32.gmra.mxu2 %v3723_v22 }
 0x22e   : > { %v1993_v39 = vmul.f32 %v3738_v44, %v1786_v30  ;;  %1590 = vmatmul.f32.gmra.mxu3 %v3779_v62 }
 0x22f   : > { %v1381_v0 = vpop.f32.mrf.mxu2  ;;  %v1705_v6 = vpop.f32.mrf.mxu0 }
 0x230   : > { %v2029_v35 = vadd.f32 %v3745_v3, %v1993_v39  ;;  %v1463_v49 = vadd.f32 %v1381_v0, %v1261_v26 }
 0x231   : > { %v1182_v11 = vpop.f32.mrf.mxu1  ;;  %v1543_v37 = vpop.f32.mrf.mxu3 }
 0x232   : > { %v2061_v19 = vmax.f32 %v2029_v35, 0.0  ;;  %v1625_v47 = vadd.f32 %v1543_v37, %v1463_v49  ;;  %1752 = vmatmul.f32.gmra.mxu0 %v3823_v54  ;;  %v1262_v22 = vadd.f32 %v1182_v11, %v3485_v31  ;;  %v3856_v35 = vld [vmem:[%s2735_s5 + $0x19c] sm:$0xff] }
 0x234   : > { %2093 = vst [vmem:[%s3759_s21 + $0x30] sm:$0xff] %v2061_v19  ;;  %v1787_v2 = vadd.f32 %v1705_v6, %v1625_v47  ;;  %1229 = vmatmul.f32.gmra.mxu1 %v3537_v55  ;;  %1431 = vmatmul.f32.gmra.mxu2 %v3733_v48 }
 0x236   : > { %v1994_v5 = vmul.f32 %v3738_v44, %v1787_v2  ;;  %1593 = vmatmul.f32.gmra.mxu3 %v3790_v45 }
 0x237   : > { %v1384_v7 = vpop.f32.mrf.mxu2  ;;  %v1708_v24 = vpop.f32.mrf.mxu0 }
 0x238   : > { %v2030_v63 = vadd.f32 %v3745_v3, %v1994_v5  ;;  %v1464_v34 = vadd.f32 %v1384_v7, %v1262_v22  ;;  %v3867_v7 = vld [vmem:[%s2735_s5 + $0x1a4] sm:$0xff] }
 0x239   : > { %v1185_v1 = vpop.f32.mrf.mxu1  ;;  %v1546_v51 = vpop.f32.mrf.mxu3 }
 0x23a   : > { %v2062_v27 = vmax.f32 %v2030_v63, 0.0  ;;  %v1626_v55 = vadd.f32 %v1546_v51, %v1464_v34  ;;  %1755 = vmatmul.f32.gmra.mxu0 %v3834_v56  ;;  %v1263_v48 = vadd.f32 %v1185_v1, %v3498_v41 }
 0x23c   : > { %2094 = vst [vmem:[%s3759_s21 + $0x38] sm:$0xff] %v2062_v27  ;;  %v1788_v31 = vadd.f32 %v1708_v24, %v1626_v55  ;;  %1232 = vmatmul.f32.gmra.mxu1 %v3547_v38  ;;  %1434 = vmatmul.f32.gmra.mxu2 %v3755_v9 }
 0x23e   : > { %v1995_v61 = vmul.f32 %v3738_v44, %v1788_v31  ;;  %1596 = vmatmul.f32.gmra.mxu3 %v3801_v33 }
 0x23f   : > { %v1387_v18 = vpop.f32.mrf.mxu2  ;;  %v1711_v10 = vpop.f32.mrf.mxu0 }
 0x240   : > { %v2031_v12 = vadd.f32 %v3745_v3, %v1995_v61  ;;  %v1465_v58 = vadd.f32 %v1387_v18, %v1263_v48  ;;  %v1322_v61 = vld [vmem:[%s2735_s5 + $0x1b4] sm:$0xff] }
 0x241   : > { %v1188_v17 = vpop.f32.mrf.mxu1  ;;  %v1549_v30 = vpop.f32.mrf.mxu3 }
 0x242   : > { %v2063_v26 = vmax.f32 %v2031_v12, 0.0  ;;  %v1627_v38 = vadd.f32 %v1549_v30, %v1465_v58  ;;  %1758 = vmatmul.f32.gmra.mxu0 %v3845_v40  ;;  %v1264_v9 = vadd.f32 %v1188_v17, %v3517_v32  ;;  %v797_v17 = vld [vmem:[%s2735_s5 + $0x1ba] sm:$0xff] }
 0x244   : > { %2095 = vst [vmem:[%s3759_s21 + $0x40] sm:$0xff] %v2063_v26  ;;  %v1789_v41 = vadd.f32 %v1711_v10, %v1627_v38  ;;  %1235 = vmatmul.f32.gmra.mxu1 %v3557_v60  ;;  %1437 = vmatmul.f32.gmra.mxu2 %v3768_v46 }
 0x246   : > { %v1996_v39 = vmul.f32 %v3738_v44, %v1789_v41  ;;  %1599 = vmatmul.f32.gmra.mxu3 %v3812_v23 }
 0x247   : > { %v1390_v0 = vpop.f32.mrf.mxu2  ;;  %v1714_v6 = vpop.f32.mrf.mxu0 }
 0x248   : > { %v2032_v49 = vadd.f32 %v3745_v3, %v1996_v39  ;;  %v1466_v11 = vadd.f32 %v1390_v0, %v1264_v9  ;;  %v1323_v9 = vld [vmem:[%s2735_s5 + $0x1bc] sm:$0xff] }
 0x249   : > { %v1191_v37 = vpop.f32.mrf.mxu1  ;;  %v1552_v19 = vpop.f32.mrf.mxu3 }
 0x24a   : > { %v2064_v47 = vmax.f32 %v2032_v49, 0.0  ;;  %v1628_v60 = vadd.f32 %v1552_v19, %v1466_v11  ;;  %1761 = vmatmul.f32.gmra.mxu0 %v3856_v35  ;;  %v1265_v46 = vadd.f32 %v1191_v37, %v3531_v29  ;;  %v798_v11 = vld [vmem:[%s2735_s5 + $0x1ca] sm:$0xff] }
 0x24c   : > { %2096 = vst [vmem:[%s3759_s21 + $0x48] sm:$0xff] %v2064_v47  ;;  %v1790_v32 = vadd.f32 %v1714_v6, %v1628_v60  ;;  %1238 = vmatmul.f32.gmra.mxu1 %v3567_v14  ;;  %1440 = vmatmul.f32.gmra.mxu2 %v3779_v62  ;;  %v796_v14 = vld [vmem:[%s2735_s5 + $0x1b2] sm:$0xff] }
 0x24e   : > { %v1997_v2 = vmul.f32 %v3738_v44, %v1790_v32  ;;  %1602 = vmatmul.f32.gmra.mxu3 %v3823_v54  ;;  %v1324_v32 = vld [vmem:[%s2735_s5 + $0x1cc] sm:$0xff] }
 0x24f   : > { %v1393_v22 = vpop.f32.mrf.mxu2  ;;  %v1717_v5 = vpop.f32.mrf.mxu0 }
 0x250   : > { %v2033_v24 = vadd.f32 %v3745_v3, %v1997_v2  ;;  %v1467_v63 = vadd.f32 %v1393_v22, %v1265_v46 }
 0x251   : > { %v1194_v34 = vpop.f32.mrf.mxu1  ;;  %v1555_v1 = vpop.f32.mrf.mxu3 }
 0x252   : > { %v2065_v51 = vmax.f32 %v2033_v24, 0.0  ;;  %v1629_v27 = vadd.f32 %v1555_v1, %v1467_v63  ;;  %1764 = vmatmul.f32.gmra.mxu0 %v3867_v7  ;;  %v1266_v62 = vadd.f32 %v1194_v34, %v3541_v42  ;;  %v799_v24 = vld [vmem:[%s2735_s5 + $0x1d2] sm:$0xff] }
 0x254   : > { %2097 = vst [vmem:[%s3759_s21 + $0x50] sm:$0xff] %v2065_v51  ;;  %v1791_v29 = vadd.f32 %v1717_v5, %v1629_v27  ;;  %1241 = vmatmul.f32.gmra.mxu1 %v796_v14  ;;  %1443 = vmatmul.f32.gmra.mxu2 %v3790_v45  ;;  %v1325_v27 = vld [vmem:[%s2735_s5 + $0x1d4] sm:$0xff]  ;;  %s2410_s5 = sshll.u32 %s2593_s18, 8  ;;  %s2120_s18 = scalar_lea.sflag [#allocation4], %s272_s11 }
 0x255   : > { %s2135_s26 = scalar_lea.hbm %s4014_s4, %s2410_s5 }
 0x256   : > { %v1998_v55 = vmul.f32 %v3738_v44, %v1791_v29  ;;  %1605 = vmatmul.f32.gmra.mxu3 %v3834_v56  ;;  %s2138_s30 = sshll.u32 %s2135_s26, 4  ;;  %s2139_s30 = int_to_ptr.hbm [resolvable:$true] %s2138_s30 }
 0x257   : > { %v1396_v31 = vpop.f32.mrf.mxu2  ;;  %v1720_v48 = vpop.f32.mrf.mxu0  ;;  %s2537_s6 = sshra.s32 %s2139_s30, 4  ;;  %s2538_s6 = int_to_ptr.hbm [resolvable:$true] %s2537_s6 }
 0x258   : > { %v2034_v18 = vadd.f32 %v3745_v3, %v1998_v55  ;;  %v1468_v10 = vadd.f32 %v1396_v31, %v1266_v62  ;;  %s2539_s7 = scalar_lea.hbm %s2538_s6, 256  ;;  %p2544_p1 = scmp.lt.s32.totalorder %s2538_s6, %s4014_s4 }
 0x259   : > { %v1197_v12 = vpop.f32.mrf.mxu1  ;;  %v1558_v58 = vpop.f32.mrf.mxu3  ;;  %p2540_p12 = scmp.ne.s32.totalorder %s2538_s6, %s2539_s7  ;;  %p2545_p2 = scmp.lt.s32.totalorder %s2543_s10, %s2539_s7 }
 0x25a   : > { %v2066_v30 = vmax.f32 %v2034_v18, 0.0  ;;  %v1630_v26 = vadd.f32 %v1558_v58, %v1468_v10  ;;  %1767 = vmatmul.f32.gmra.mxu0 %v1322_v61  ;;  %v1267_v45 = vadd.f32 %v1197_v12, %v3551_v15  ;;  %v4042_v18 = vld [vmem:[#allocation17_spill] sm:$0xff] }
 0x25b   : > { %p2541_p13 = pnand %p2540_p12, %p2670_p4  ;;  %p2546_p3 = por %p2545_p2, %p2544_p1 }
 0x25c   : > { %2098 = vst [vmem:[%s3759_s21 + $0x58] sm:$0xff] %v2066_v30  ;;  %v1792_v42 = vadd.f32 %v1720_v48, %v1630_v26  ;;  %1244 = vmatmul.f32.gmra.mxu1 %v797_v17  ;;  %1446 = vmatmul.f32.gmra.mxu2 %v3801_v33 }
 0x25d   : > { %p2542_p0 = pneg %p2541_p13 }
 0x25e   : > { %v1999_v56 = vmul.f32 %v3738_v44, %v1792_v42  ;;  %1608 = vmatmul.f32.gmra.mxu3 %v3845_v40 }
 0x25f   : > { %v1399_v38 = vpop.f32.mrf.mxu2  ;;  %v1723_v41 = vpop.f32.mrf.mxu0  ;;  %p2547_p5 = pnand %p2546_p3, %p2542_p0 }
 0x260   : > { %v2035_v39 = vadd.f32 %v3745_v3, %v1999_v56  ;;  %v1469_v0 = vadd.f32 %v1399_v38, %v1267_v45 }
 0x261   : > { %v1200_v6 = vpop.f32.mrf.mxu1  ;;  %v1561_v49 = vpop.f32.mrf.mxu3 }
 0x262   : > { %v2067_v37 = vmax.f32 %v2035_v39, 0.0  ;;  %v1631_v19 = vadd.f32 %v1561_v49, %v1469_v0  ;;  %1770 = vmatmul.f32.gmra.mxu0 %v1323_v9  ;;  %v1268_v33 = vadd.f32 %v1200_v6, %v3561_v50  ;;  %v4041_v50 = vld [vmem:[#allocation16_spill] sm:$0xff] }
 0x264   : > { %2099 = vst [vmem:[%s3759_s21 + $0x60] sm:$0xff] %v2067_v37  ;;  %v1793_v15 = vadd.f32 %v1723_v41, %v1631_v19  ;;  %1247 = vmatmul.f32.gmra.mxu1 %v798_v11  ;;  %1449 = vmatmul.f32.gmra.mxu2 %v3812_v23  ;;  %v4043_v41 = vld [vmem:[#allocation18_spill] sm:$0xff] }
 0x266   : > { %v2000_v40 = vmul.f32 %v3738_v44, %v1793_v15  ;;  %1611 = vmatmul.f32.gmra.mxu3 %v3856_v35 }
 0x267   : > { %v1402_v47 = vpop.f32.mrf.mxu2  ;;  %v1726_v60 = vpop.f32.mrf.mxu0 }
 0x268   : > { %v2036_v46 = vadd.f32 %v3745_v3, %v2000_v40  ;;  %v1470_v2 = vadd.f32 %v1402_v47, %v1268_v33 }
 0x269   : > { %v1203_v22 = vpop.f32.mrf.mxu1  ;;  %v1564_v5 = vpop.f32.mrf.mxu3 }
 0x26a   : > { %v2068_v63 = vmax.f32 %v2036_v46, 0.0  ;;  %v1632_v34 = vadd.f32 %v1564_v5, %v1470_v2  ;;  %1773 = vmatmul.f32.gmra.mxu0 %v1324_v32  ;;  %v1269_v35 = vadd.f32 %v1203_v22, %v4041_v50 }
 0x26c   : > { %2100 = vst [vmem:[%s3759_s21 + $0x68] sm:$0xff] %v2068_v63  ;;  %v1794_v23 = vadd.f32 %v1726_v60, %v1632_v34  ;;  %1250 = vmatmul.f32.gmra.mxu1 %v799_v24  ;;  %1452 = vmatmul.f32.gmra.mxu2 %v3823_v54 }
 0x26e   : > { %v2001_v1 = vmul.f32 %v3738_v44, %v1794_v23  ;;  %1614 = vmatmul.f32.gmra.mxu3 %v3867_v7 }
 0x26f   : > { %v1405_v14 = vpop.f32.mrf.mxu2  ;;  %v1729_v51 = vpop.f32.mrf.mxu0 }
 0x270   : > { %v2037_v29 = vadd.f32 %v3745_v3, %v2001_v1  ;;  %v1471_v62 = vadd.f32 %v1405_v14, %v1269_v35 }
 0x271   : > { %v1206_v55 = vpop.f32.mrf.mxu1  ;;  %v1567_v31 = vpop.f32.mrf.mxu3 }
 0x272   : > { %v2069_v48 = vmax.f32 %v2037_v29, 0.0  ;;  %v1633_v61 = vadd.f32 %v1567_v31, %v1471_v62  ;;  %1776 = vmatmul.f32.gmra.mxu0 %v1325_v27  ;;  %v1270_v10 = vadd.f32 %v1206_v55, %v4042_v18 }
 0x274   : > { %2101 = vst [vmem:[%s3759_s21 + $0x70] sm:$0xff] %v2069_v48  ;;  %v1795_v54 = vadd.f32 %v1729_v51, %v1633_v61 }
 0x276   : > { %v2002_v12 = vmul.f32 %v3738_v44, %v1795_v54 }
 0x277   : > { %v1408_v58 = vpop.f32.mrf.mxu2  ;;  %v1732_v7 = vpop.f32.mrf.mxu0 }
 0x278   : > { %v2038_v17 = vadd.f32 %v3745_v3, %v2002_v12  ;;  %v1472_v30 = vadd.f32 %v1408_v58, %v1270_v10 }
 0x279   : > { %v1209_v26 = vpop.f32.mrf.mxu1  ;;  %v1570_v42 = vpop.f32.mrf.mxu3 }
 0x27a   : > { %v2070_v45 = vmax.f32 %v2038_v17, 0.0  ;;  %v1634_v56 = vadd.f32 %v1570_v42, %v1472_v30  ;;  %v1271_v9 = vadd.f32 %v1209_v26, %v4043_v41 }
 0x27c   : > { %2102 = vst [vmem:[%s3759_s21 + $0x78] sm:$0xff] %v2070_v45  ;;  %v1796_v38 = vadd.f32 %v1732_v7, %v1634_v56 }
 0x27e   : > { %v2003_v39 = vmul.f32 %v3738_v44, %v1796_v38 }
 0x27f   : > { %v1411_v0 = vpop.f32.mrf.mxu2  ;;  %v1735_v6 = vpop.f32.mrf.mxu0 }
 0x280   : > { %v2039_v49 = vadd.f32 %v3745_v3, %v2003_v39  ;;  %v1473_v11 = vadd.f32 %v1411_v0, %v1271_v9 }
 0x281   : > { %v1212_v37 = vpop.f32.mrf.mxu1  ;;  %v1573_v19 = vpop.f32.mrf.mxu3 }
 0x282   : > { %v2071_v15 = vmax.f32 %v2039_v49, 0.0  ;;  %v1635_v33 = vadd.f32 %v1573_v19, %v1473_v11  ;;  %v1272_v47 = vadd.f32 %v1212_v37, %v3602_v57 }
 0x284   : > { %2103 = vst [vmem:[%s3759_s21 + $0x80] sm:$0xff] %v2071_v15  ;;  %v1797_v40 = vadd.f32 %v1735_v6, %v1635_v33 }
 0x286   : > { %v2004_v60 = vmul.f32 %v3738_v44, %v1797_v40 }
 0x287   : > { %v1414_v32 = vpop.f32.mrf.mxu2  ;;  %v1738_v46 = vpop.f32.mrf.mxu0 }
 0x288   : > { %v2040_v2 = vadd.f32 %v3745_v3, %v2004_v60  ;;  %v1474_v22 = vadd.f32 %v1414_v32, %v1272_v47 }
 0x289   : > { %v1215_v5 = vpop.f32.mrf.mxu1  ;;  %v1576_v24 = vpop.f32.mrf.mxu3 }
 0x28a   : > { %v2072_v63 = vmax.f32 %v2040_v2, 0.0  ;;  %v1636_v34 = vadd.f32 %v1576_v24, %v1474_v22  ;;  %v1273_v50 = vadd.f32 %v1215_v5, %v3610_v16 }
 0x28c   : > { %2104 = vst [vmem:[%s3759_s21 + $0x88] sm:$0xff] %v2072_v63  ;;  %v1798_v23 = vadd.f32 %v1738_v46, %v1636_v34 }
 0x28e   : > { %v2005_v35 = vmul.f32 %v3738_v44, %v1798_v23 }
 0x28f   : > { %v1417_v1 = vpop.f32.mrf.mxu2  ;;  %v1741_v57 = vpop.f32.mrf.mxu0 }
 0x290   : > { %v2041_v14 = vadd.f32 %v3745_v3, %v2005_v35  ;;  %v1475_v51 = vadd.f32 %v1417_v1, %v1273_v50 }
 0x291   : > { %v1218_v27 = vpop.f32.mrf.mxu1  ;;  %v1579_v29 = vpop.f32.mrf.mxu3 }
 0x292   : > { %v2073_v62 = vmax.f32 %v2041_v14, 0.0  ;;  %v1637_v55 = vadd.f32 %v1579_v29, %v1475_v51  ;;  %v1274_v48 = vadd.f32 %v1218_v27, %v3619_v25 }
 0x294   : > { %2105 = vst [vmem:[%s3759_s21 + $0x90] sm:$0xff] %v2073_v62  ;;  %v1799_v31 = vadd.f32 %v1741_v57, %v1637_v55 }
 0x296   : > { %v2006_v61 = vmul.f32 %v3738_v44, %v1799_v31 }
 0x297   : > { %v1420_v54 = vpop.f32.mrf.mxu2  ;;  %v1744_v16 = vpop.f32.mrf.mxu0 }
 0x298   : > { %v2042_v18 = vadd.f32 %v3745_v3, %v2006_v61  ;;  %v1476_v10 = vadd.f32 %v1420_v54, %v1274_v48 }
 0x299   : > { %v1221_v12 = vpop.f32.mrf.mxu1  ;;  %v1582_v58 = vpop.f32.mrf.mxu3 }
 0x29a   : > { %v2074_v7 = vmax.f32 %v2042_v18, 0.0  ;;  %v1638_v17 = vadd.f32 %v1582_v58, %v1476_v10  ;;  %v1275_v26 = vadd.f32 %v1221_v12, %v3628_v36 }
 0x29c   : > { %2106 = vst [vmem:[%s3759_s21 + $0x98] sm:$0xff] %v2074_v7  ;;  %v1800_v30 = vadd.f32 %v1744_v16, %v1638_v17 }
 0x29e   : > { %v2007_v42 = vmul.f32 %v3738_v44, %v1800_v30 }
 0x29f   : > { %v1423_v45 = vpop.f32.mrf.mxu2  ;;  %v1747_v25 = vpop.f32.mrf.mxu0 }
 0x2a0   : > { %v2043_v56 = vadd.f32 %v3745_v3, %v2007_v42  ;;  %v1477_v38 = vadd.f32 %v1423_v45, %v1275_v26 }
 0x2a1   : > { %v1224_v41 = vpop.f32.mrf.mxu1  ;;  %v1585_v9 = vpop.f32.mrf.mxu3 }
 0x2a2   : > { %v2075_v39 = vmax.f32 %v2043_v56, 0.0  ;;  %v1639_v0 = vadd.f32 %v1585_v9, %v1477_v38  ;;  %v1276_v49 = vadd.f32 %v1224_v41, %v3637_v8 }
 0x2a4   : > { %2107 = vst [vmem:[%s3759_s21 + $0xa0] sm:$0xff] %v2075_v39  ;;  %v1801_v6 = vadd.f32 %v1747_v25, %v1639_v0 }
 0x2a6   : > { %v2008_v11 = vmul.f32 %v3738_v44, %v1801_v6 }
 0x2a7   : > { %v1426_v37 = vpop.f32.mrf.mxu2  ;;  %v1750_v36 = vpop.f32.mrf.mxu0 }
 0x2a8   : > { %v2044_v19 = vadd.f32 %v3745_v3, %v2008_v11  ;;  %v1478_v15 = vadd.f32 %v1426_v37, %v1276_v49 }
 0x2a9   : > { %v1227_v33 = vpop.f32.mrf.mxu1  ;;  %v1588_v40 = vpop.f32.mrf.mxu3 }
 0x2aa   : > { %v2076_v47 = vmax.f32 %v2044_v19, 0.0  ;;  %v1640_v60 = vadd.f32 %v1588_v40, %v1478_v15  ;;  %v1277_v46 = vadd.f32 %v1227_v33, %v3646_v20 }
 0x2ac   : > { %2108 = vst [vmem:[%s3759_s21 + $0xa8] sm:$0xff] %v2076_v47  ;;  %v1802_v32 = vadd.f32 %v1750_v36, %v1640_v60 }
 0x2ae   : > { %v2009_v2 = vmul.f32 %v3738_v44, %v1802_v32 }
 0x2af   : > { %v1429_v22 = vpop.f32.mrf.mxu2  ;;  %v1753_v8 = vpop.f32.mrf.mxu0 }
 0x2b0   : > { %v2045_v5 = vadd.f32 %v3745_v3, %v2009_v2  ;;  %v1479_v24 = vadd.f32 %v1429_v22, %v1277_v46 }
 0x2b1   : > { %v1230_v63 = vpop.f32.mrf.mxu1  ;;  %v1591_v34 = vpop.f32.mrf.mxu3 }
 0x2b2   : > { %v2077_v23 = vmax.f32 %v2045_v5, 0.0  ;;  %v1641_v50 = vadd.f32 %v1591_v34, %v1479_v24  ;;  %v1278_v1 = vadd.f32 %v1230_v63, %v3656_v43 }
 0x2b4   : > { %2109 = vst [vmem:[%s3759_s21 + $0xb0] sm:$0xff] %v2077_v23  ;;  %v1803_v35 = vadd.f32 %v1753_v8, %v1641_v50 }
 0x2b6   : > { %v2010_v57 = vmul.f32 %v3738_v44, %v1803_v35 }
 0x2b7   : > { %v1432_v14 = vpop.f32.mrf.mxu2  ;;  %v1756_v20 = vpop.f32.mrf.mxu0 }
 0x2b8   : > { %v2046_v51 = vadd.f32 %v3745_v3, %v2010_v57  ;;  %v1480_v27 = vadd.f32 %v1432_v14, %v1278_v1 }
 0x2b9   : > { %v1233_v29 = vpop.f32.mrf.mxu1  ;;  %v1594_v62 = vpop.f32.mrf.mxu3 }
 0x2ba   : > { %v2078_v55 = vmax.f32 %v2046_v51, 0.0  ;;  %v1642_v31 = vadd.f32 %v1594_v62, %v1480_v27  ;;  %v1279_v61 = vadd.f32 %v1233_v29, %v3666_v4 }
 0x2bc   : > { %2110 = vst [vmem:[%s3759_s21 + $0xb8] sm:$0xff] %v2078_v55  ;;  %v1804_v48 = vadd.f32 %v1756_v20, %v1642_v31 }
 0x2be   : > { %v2011_v54 = vmul.f32 %v3738_v44, %v1804_v48 }
 0x2bf   : > { %v1435_v16 = vpop.f32.mrf.mxu2  ;;  %v1759_v43 = vpop.f32.mrf.mxu0 }
 0x2c0   : > { %v2047_v18 = vadd.f32 %v3745_v3, %v2011_v54  ;;  %v1481_v10 = vadd.f32 %v1435_v16, %v1279_v61 }
 0x2c1   : > { %v1236_v12 = vpop.f32.mrf.mxu1  ;;  %v1597_v58 = vpop.f32.mrf.mxu3 }
 0x2c2   : > { %v2079_v7 = vmax.f32 %v2047_v18, 0.0  ;;  %v1643_v17 = vadd.f32 %v1597_v58, %v1481_v10  ;;  %v1280_v26 = vadd.f32 %v1236_v12, %v3676_v13 }
 0x2c4   : > { %2111 = vst [vmem:[%s3759_s21 + $0xc0] sm:$0xff] %v2079_v7  ;;  %v1805_v30 = vadd.f32 %v1759_v43, %v1643_v17 }
 0x2c6   : > { %v2012_v42 = vmul.f32 %v3738_v44, %v1805_v30 }
 0x2c7   : > { %v1438_v45 = vpop.f32.mrf.mxu2  ;;  %v1762_v4 = vpop.f32.mrf.mxu0 }
 0x2c8   : > { %v2048_v25 = vadd.f32 %v3745_v3, %v2012_v42  ;;  %v1482_v56 = vadd.f32 %v1438_v45, %v1280_v26 }
 0x2c9   : > { %v1239_v38 = vpop.f32.mrf.mxu1  ;;  %v1600_v41 = vpop.f32.mrf.mxu3 }
 0x2ca   : > { %v2080_v9 = vmax.f32 %v2048_v25, 0.0  ;;  %v1644_v39 = vadd.f32 %v1600_v41, %v1482_v56  ;;  %v1281_v6 = vadd.f32 %v1239_v38, %v3686_v21 }
 0x2cc   : > { %2112 = vst [vmem:[%s3759_s21 + $0xc8] sm:$0xff] %v2080_v9  ;;  %v1806_v0 = vadd.f32 %v1762_v4, %v1644_v39 }
 0x2ce   : > { %v2013_v49 = vmul.f32 %v3738_v44, %v1806_v0 }
 0x2cf   : > { %v1441_v11 = vpop.f32.mrf.mxu2  ;;  %v1765_v13 = vpop.f32.mrf.mxu0 }
 0x2d0   : > { %v2049_v37 = vadd.f32 %v3745_v3, %v2013_v49  ;;  %v1483_v36 = vadd.f32 %v1441_v11, %v1281_v6 }
 0x2d1   : > { %v1242_v19 = vpop.f32.mrf.mxu1  ;;  %v1603_v15 = vpop.f32.mrf.mxu3 }
 0x2d2   : > { %v2081_v33 = vmax.f32 %v2049_v37, 0.0  ;;  %v1645_v40 = vadd.f32 %v1603_v15, %v1483_v36  ;;  %v1282_v60 = vadd.f32 %v1242_v19, %v3696_v52 }
 0x2d4   : > { %2113 = vst [vmem:[%s3759_s21 + $0xd0] sm:$0xff] %v2081_v33  ;;  %v1807_v47 = vadd.f32 %v1765_v13, %v1645_v40 }
 0x2d6   : > { %v2014_v32 = vmul.f32 %v3738_v44, %v1807_v47 }
 0x2d7   : > { %v1444_v46 = vpop.f32.mrf.mxu2  ;;  %v1768_v21 = vpop.f32.mrf.mxu0 }
 0x2d8   : > { %v2050_v2 = vadd.f32 %v3745_v3, %v2014_v32  ;;  %v1484_v22 = vadd.f32 %v1444_v46, %v1282_v60 }
 0x2d9   : > { %v1245_v8 = vpop.f32.mrf.mxu1  ;;  %v1606_v5 = vpop.f32.mrf.mxu3 }
 0x2da   : > { %v2082_v24 = vmax.f32 %v2050_v2, 0.0  ;;  %v1646_v63 = vadd.f32 %v1606_v5, %v1484_v22  ;;  %v1283_v23 = vadd.f32 %v1245_v8, %v3706_v53 }
 0x2dc   : > { %2114 = vst [vmem:[%s3759_s21 + $0xd8] sm:$0xff] %v2082_v24  ;;  %v1808_v34 = vadd.f32 %v1768_v21, %v1646_v63 }
 0x2de   : > { %v2015_v50 = vmul.f32 %v3738_v44, %v1808_v34 }
 0x2df   : > { %v1447_v35 = vpop.f32.mrf.mxu2  ;;  %v1771_v52 = vpop.f32.mrf.mxu0 }
 0x2e0   : > { %v2051_v1 = vadd.f32 %v3745_v3, %v2015_v50  ;;  %v1485_v57 = vadd.f32 %v1447_v35, %v1283_v23 }
 0x2e1   : > { %v1248_v14 = vpop.f32.mrf.mxu1  ;;  %v1609_v20 = vpop.f32.mrf.mxu3 }
 0x2e2   : > { %v2083_v51 = vmax.f32 %v2051_v1, 0.0  ;;  %v1647_v27 = vadd.f32 %v1609_v20, %v1485_v57  ;;  %v1284_v62 = vadd.f32 %v1248_v14, %v3716_v59 }
 0x2e4   : > { %2115 = vst [vmem:[%s3759_s21 + $0xe0] sm:$0xff] %v2083_v51  ;;  %v1809_v29 = vadd.f32 %v1771_v52, %v1647_v27 }
 0x2e6   : > { %v2016_v55 = vmul.f32 %v3738_v44, %v1809_v29 }
 0x2e7   : > { %v1450_v53 = vpop.f32.mrf.mxu2  ;;  %v1774_v31 = vpop.f32.mrf.mxu0 }
 0x2e8   : > { %v2052_v48 = vadd.f32 %v3745_v3, %v2016_v55  ;;  %v1486_v61 = vadd.f32 %v1450_v53, %v1284_v62 }
 0x2e9   : > { %v1612_v54 = vpop.f32.mrf.mxu3  ;;  %v1251_v18 = vpop.f32.mrf.mxu1 }
 0x2ea   : > { %v2084_v16 = vmax.f32 %v2052_v48, 0.0  ;;  %v1648_v43 = vadd.f32 %v1612_v54, %v1486_v61  ;;  %v1285_v12 = vadd.f32 %v1251_v18, %v3726_v28 }
 0x2ec   : > { %2116 = vst [vmem:[%s3759_s21 + $0xe8] sm:$0xff] %v2084_v16  ;;  %v1810_v10 = vadd.f32 %v1774_v31, %v1648_v43 }
 0x2ee   : > { %v2017_v59 = vmul.f32 %v3738_v44, %v1810_v10 }
 0x2ef   : > { %v1453_v58 = vpop.f32.mrf.mxu2  ;;  %v1777_v26 = vpop.f32.mrf.mxu0 }
 0x2f0   : > { %v2053_v7 = vadd.f32 %v3745_v3, %v2017_v59  ;;  %v1487_v17 = vadd.f32 %v1453_v58, %v1285_v12 }
 0x2f1   : > { %v1615_v30 = vpop.f32.mrf.mxu3 }
 0x2f2   : > { %v2085_v42 = vmax.f32 %v2053_v7, 0.0  ;;  %v1649_v45 = vadd.f32 %v1615_v30, %v1487_v17 }
 0x2f4   : > { %2117 = vst [vmem:[%s3759_s21 + $0xf0] sm:$0xff] %v2085_v42  ;;  %v1811_v28 = vadd.f32 %v1777_v26, %v1649_v45 }
 0x2f6   : > { %v2018_v4 = vmul.f32 %v3738_v44, %v1811_v28 }
 0x2f8   : > { %v2054_v25 = vadd.f32 %v3745_v3, %v2018_v4 }
 0x2fa   : > { %v2086_v56 = vmax.f32 %v2054_v25, 0.0 }
 0x2fc   : > { %2118 = vst [vmem:[%s3759_s21 + $0xf8] sm:$0xff] %v2086_v56 }
 0x2fd   : > { %2550 = shalt.err (!%p2547_p5)
}
 0x2fe   : > { %s2603_s11 = smov 128   ;;  %s2604_s14 = smov 8  }
 0x2ff   : > { %2460 = dma.vmem_to_hbm [thread:$0]  (%p2670_p4), %s2137_s29, 4096, %s2139_s30, %s2120_s18, %s2603_s11, %s2603_s11, %s2604_s14  }
 0x300 PF: > { %p2466_p6 = scmp.ge.s32.totalorder %s2601_s20, 2  ;;  %s2153_s21 = sand.u32 1, %s2581_s15  }
 0x301   : > { %s2154_s5 = scalar_lea.sflag [#allocation4], %s2153_s21 }
 0x302   : > { %p2463_p7 = pnand %p2466_p6, %p2677_p8 }
 0x304   : > { %p2464_p9 = pneg %p2463_p7 }
 0x306   : > { %2576 = dma.done.wait (%p2464_p9), %s2154_s5, 4096  }
 0x307   : > { %2578 = vsyncadd (%p2464_p9), %s2154_s5, 4294963200  ;;  %s17_s20 = sadd.s32 1, %s2601_s20   ;;  %s4044_s15 = smov %s2585_s16 }
 0x308   : > { %p14_p10 = scmp.ge.s32.totalorder %s17_s20, 4   ;;  %s4045_s16 = smov %s2589_s17 }
 0x309   : > { %s4046_s17 = smov %s2683_s28  ;;  %s4047_s18 = smov %s2597_s19 }
 0x30a   : > { %s4048_s19 = smov %s4050_s23  ;;  %16 = sbr.rel (!%p14_p10) target bundleno = 4 (0x4), region = 100 }
 0x30f   :  { %2160 = vsyncpa [#allocation4], 1 }
 0x310   :  { %2162 = vsyncpa [#allocation4 + $0x1], 1 }

</bundles_post_ra>
